<compile_context>
chip_gen: v5e
topology: v5e:2x2
jax: 0.10.0
libtpu: 0.0.40
codegen_flags: <defaults>
</compile_context>

<pallas_src>
import functools

import numpy as np
import jax
import jax.numpy as jnp
from jax.experimental import pallas as pl
from jax.experimental.pallas import tpu as pltpu


# ----------------------------------------------------------------------------
# helpers
# ----------------------------------------------------------------------------
def _round_up(x, m):
    return ((x + m - 1) // m) * m


def _nbytes(x):
    return int(np.prod(x.shape)) * np.dtype(x.dtype).itemsize


def _vmem_limit(nbytes):
    # double-buffer headroom + 4 MiB slack, clamped to [32 MiB, 96 MiB].
    # 96 MiB is fine on v5e/v6e (128 MiB physical); realistic seq2seq sizes stay
    # at the low end, which also fits v7x's 64 MiB physical VMEM.
    return int(min(max(2 * nbytes + (4 << 20), 32 << 20), 96 << 20))


def _const_spec(shape):
    nd = len(shape)
    return pl.BlockSpec(shape, lambda j, _nd=nd: (0,) * _nd)


# ----------------------------------------------------------------------------
# Kernel A: prologue = attention + stacked single-step GRU + proj1 + proj2.
# Single grid step; every operand is resident in VMEM.
# refs: [emb, h_in, (enc, attn_w if isatt),
#        per layer: (w_ih_x, w_ih_a | w_ih), w_hh, b_ih, b_hh,
#        w1, b1, w2, b2, | y2_out, hid_out]
# ----------------------------------------------------------------------------
def _prologue_kernel(*refs, n_layers, isatt):
    y2_ref, hid_ref = refs[-2], refs[-1]
    it = iter(refs[:-2])

    emb_ref = next(it)
    h_in_ref = next(it)

    emb = emb_ref[...]                                                  # [Bp, E]

    attn = None
    if isatt:
        enc_ref = next(it)
        attn_w_ref = next(it)
        enc = enc_ref[...]                                              # [Bp, S, H2]
        h0 = h_in_ref[0]                                                # [Bp, H2]
        # score[b,s] = (enc[b,s] @ W.T) . h0[b] == enc[b,s] . (h0[b] @ W)
        v = jnp.dot(h0, attn_w_ref[...],
                    preferred_element_type=jnp.float32)                 # [Bp, H2]
        score = jnp.sum(enc * v[:, None, :], axis=-1)                   # [Bp, S]  (S on lanes)
        score = score - jnp.max(score, axis=-1, keepdims=True)
        p = jnp.exp(score)
        inv = pl.reciprocal(jnp.sum(p, axis=-1, keepdims=True), approx=True)
        alpha = p * inv                                                 # [Bp, S]
        attn = jnp.sum(alpha[:, :, None] * enc, axis=1)                 # [Bp, H2]

    # Stacked single-step GRU, PyTorch gate order (r, z, n), gate-split weights.
    layer_in = emb
    for l in range(n_layers):
        h_prev = h_in_ref[l]                                            # [Bp, H2]
        if l == 0 and isatt:
            # concat-free layer 0: x = [emb, attn]  ->  emb@Wx + attn@Wa
            w_ih_x = next(it)
            w_ih_a = next(it)
            whh = next(it)
            bih = next(it)
            bhh = next(it)
            gi = [jnp.dot(emb, w_ih_x[g], preferred_element_type=jnp.float32)
                  + jnp.dot(attn, w_ih_a[g], preferred_element_type=jnp.float32)
                  + bih[g] for g in range(3)]
        else:
            wih = next(it)
            whh = next(it)
            bih = next(it)
            bhh = next(it)
            x_in = emb if l == 0 else layer_in
            gi = [jnp.dot(x_in, wih[g], preferred_element_type=jnp.float32)
                  + bih[g] for g in range(3)]
        gh = [jnp.dot(h_prev, whh[g], preferred_element_type=jnp.float32)
              + bhh[g] for g in range(3)]
        r = jax.nn.sigmoid(gi[0] + gh[0])
        z = jax.nn.sigmoid(gi[1] + gh[1])
        n = jnp.tanh(gi[2] + r * gh[2])
        h_new = (1.0 - z) * n + z * h_prev
        hid_ref[l] = h_new.astype(hid_ref.dtype)
        layer_in = h_new

    # embedding2vocab1 / embedding2vocab2 (no nonlinearity in the torch code)
    w1 = next(it); b1 = next(it); w2 = next(it); b2 = next(it)
    y1 = jnp.dot(layer_in, w1[...], preferred_element_type=jnp.float32) + b1[...]
    y2 = jnp.dot(y1, w2[...], preferred_element_type=jnp.float32) + b2[...]
    y2_ref[...] = y2.astype(y2_ref.dtype)


# ----------------------------------------------------------------------------
# Kernel B: vocab projection, tiled over the (lane-dense) vocab axis.
# "parallel" grid -> megacore-shardable on v7x; w3 streamed in bf16.
# ----------------------------------------------------------------------------
def _vocab_proj_kernel(y2_ref, w3_ref, b3_ref, pred_ref):
    y2 = y2_ref[...].astype(jnp.bfloat16)                               # f32 -> bf16 LHS
    acc = jnp.dot(y2, w3_ref[...], preferred_element_type=jnp.float32)  # bf16 x bf16, f32 acc
    pred_ref[...] = (acc + b3_ref[...]).astype(pred_ref.dtype)


# ----------------------------------------------------------------------------
# One-time parameter preparation (layout, padding, bf16 cast of w3).
# ----------------------------------------------------------------------------
def prepare_decoder(params, *, isatt=True, tile_v=512):
    E = int(params["emb"].shape[1])
    H2 = int(params["w1_t"].shape[0])
    V = int(params["b3"].shape[0])
    n_layers = len(params["gru"])

    # Vocab tile: fat lane-dense tiles; tiny vocabs -> single one-shot tile.
    if V <= 2048:
        TN = _round_up(V, 128)
        Vp = TN
    else:
        TN = max(128, _round_up(int(tile_v), 128))
        Vp = _round_up(V, TN)

    w3 = jnp.pad(params["w3_t"].astype(jnp.float32),
                 ((0, 0), (0, Vp - V))).astype(jnp.bfloat16)            # [4H2, Vp] bf16
    b3 = jnp.pad(params["b3"].astype(jnp.float32),
                 ((0, Vp - V),)).reshape(1, Vp)                         # [1, Vp] f32

    gru = []
    for l, g in enumerate(params["gru"]):
        ent = {
            "w_hh": g["w_hh"].astype(jnp.float32),
            "b_ih": g["b_ih"].astype(jnp.float32).reshape(3, 1, H2),
            "b_hh": g["b_hh"].astype(jnp.float32).reshape(3, 1, H2),
        }
        if l == 0 and isatt:
            ent["w_ih_x"] = g["w_ih"][:, :E, :].astype(jnp.float32)     # emb half
            ent["w_ih_a"] = g["w_ih"][:, E:, :].astype(jnp.float32)     # attn half
        else:
            ent["w_ih"] = g["w_ih"].astype(jnp.float32)
        gru.append(ent)

    prepped = {
        "emb": params["emb"].astype(jnp.float32),
        "gru": gru,
        "w1": params["w1_t"].astype(jnp.float32),
        "b1": params["b1"].astype(jnp.float32).reshape(1, 2 * H2),
        "w2": params["w2_t"].astype(jnp.float32),
        "b2": params["b2"].astype(jnp.float32).reshape(1, 4 * H2),
        "w3": w3, "b3": b3,
        "isatt": isatt, "n_layers": n_layers,
        "E": E, "H2": H2, "V": V, "Vp": Vp, "TN": TN,
    }
    if isatt:
        prepped["attn_w"] = params["attn_w"].astype(jnp.float32)
    return prepped


# ----------------------------------------------------------------------------
# Decoder forward: embedding gather (JAX glue) + 2 pallas_calls.
# ----------------------------------------------------------------------------
def decoder_forward(prepped, input_ids, hidden, encoder_outputs=None):
    isatt = prepped["isatt"]
    n_layers = prepped["n_layers"]
    E, H2 = prepped["E"], prepped["H2"]
    V, Vp, TN = prepped["V"], prepped["Vp"], prepped["TN"]

    emb = prepped["emb"][input_ids].astype(jnp.float32)                 # [B, E] gather glue
    B = emb.shape[0]
    Bp = max(8, _round_up(B, 8))
    pad_b = Bp - B

    emb_p = jnp.pad(emb, ((0, pad_b), (0, 0)))
    hid_p = jnp.pad(hidden.astype(jnp.float32), ((0, 0), (0, pad_b), (0, 0)))

    inputs = [emb_p, hid_p]
    in_specs = [_const_spec((Bp, E)), _const_spec((n_layers, Bp, H2))]
    if isatt:
        S = encoder_outputs.shape[1]
        enc_p = jnp.pad(encoder_outputs.astype(jnp.float32),
                        ((0, pad_b), (0, 0), (0, 0)))
        inputs += [enc_p, prepped["attn_w"]]
        in_specs += [_const_spec((Bp, S, H2)), _const_spec((H2, H2))]
    for l in range(n_layers):
        g = prepped["gru"][l]
        if l == 0 and isatt:
            inputs += [g["w_ih_x"], g["w_ih_a"]]
            in_specs += [_const_spec((3, E, H2)), _const_spec((3, H2, H2))]
        else:
            din = E if l == 0 else H2
            inputs += [g["w_ih"]]
            in_specs += [_const_spec((3, din, H2))]
        inputs += [g["w_hh"], g["b_ih"], g["b_hh"]]
        in_specs += [_const_spec((3, H2, H2)), _const_spec((3, 1, H2)),
                     _const_spec((3, 1, H2))]
    inputs += [prepped["w1"], prepped["b1"], prepped["w2"], prepped["b2"]]
    in_specs += [_const_spec((H2, 2 * H2)), _const_spec((1, 2 * H2)),
                 _const_spec((2 * H2, 4 * H2)), _const_spec((1, 4 * H2))]

    out_shape_a = (jax.ShapeDtypeStruct((Bp, 4 * H2), jnp.float32),
                   jax.ShapeDtypeStruct((n_layers, Bp, H2), jnp.float32))
    out_specs_a = [_const_spec((Bp, 4 * H2)), _const_spec((n_layers, Bp, H2))]

    vmem_a = _vmem_limit(sum(_nbytes(x) for x in inputs)
                         + Bp * 4 * H2 * 4 + n_layers * Bp * H2 * 4)

    kernel_a = functools.partial(_prologue_kernel, n_layers=n_layers, isatt=isatt)
    y2, new_hidden_p = pl.pallas_call(
        kernel_a,
        out_shape=out_shape_a,
        grid_spec=pltpu.PrefetchScalarGridSpec(
            num_scalar_prefetch=0,
            grid=(1,),
            in_specs=in_specs,
            out_specs=out_specs_a,
        ),
        # hidden updated in place (input 1 -> output 1)
        input_output_aliases={1: 1},
        compiler_params=pltpu.CompilerParams(
            dimension_semantics=("arbitrary",),
            vmem_limit_bytes=vmem_a,
        ),
    )(*inputs)

    # Vocab projection, independent vocab tiles ("parallel" -> both v7x cores).
    vmem_b = _vmem_limit(Bp * 4 * H2 * 4 + 4 * H2 * TN * 2 + TN * 4 + Bp * TN * 4)
    pred_p = pl.pallas_call(
        _vocab_proj_kernel,
        out_shape=jax.ShapeDtypeStruct((Bp, Vp), jnp.float32),
        grid_spec=pltpu.PrefetchScalarGridSpec(
            num_scalar_prefetch=0,
            grid=(Vp // TN,),
            in_specs=[_const_spec((Bp, 4 * H2)),
                      pl.BlockSpec((4 * H2, TN), lambda j: (0, j)),
                      pl.BlockSpec((1, TN), lambda j: (0, j))],
            out_specs=pl.BlockSpec((Bp, TN), lambda j: (0, j)),
        ),
        compiler_params=pltpu.CompilerParams(
            dimension_semantics=("parallel",),
            vmem_limit_bytes=vmem_b,
        ),
    )(y2, prepped["w3"], prepped["b3"])

    prediction = pred_p[:B, :V]
    new_hidden = new_hidden_p[:, :B, :]
    return prediction, new_hidden


# ----------------------------------------------------------------------------
# Pure-JAX reference (torch-faithful math, original f32 parameter layout).
# ----------------------------------------------------------------------------
def decoder_forward_ref(params, input_ids, hidden, encoder_outputs, *, isatt=True):
    emb = params["emb"][input_ids]
    n_layers = hidden.shape[0]
    if isatt:
        W = params["attn_w"]                                            # nn.Linear weight (out, in)
        weights = jnp.einsum("bsh,kh->bsk", encoder_outputs, W)         # enc @ W.T
        score = jnp.einsum("bsk,bk->bs", weights, hidden[0])
        alpha = jax.nn.softmax(score, axis=1)
        attn = jnp.einsum("bs,bsh->bh", alpha, encoder_outputs)
        x = jnp.concatenate([emb, attn], axis=-1)
    else:
        x = emb
    new_hidden = []
    layer_in = x
    for l in range(n_layers):
        g = params["gru"][l]
        h_prev = hidden[l]
        gi_r = layer_in @ g["w_ih"][0] + g["b_ih"][0]
        gi_z = layer_in @ g["w_ih"][1] + g["b_ih"][1]
        gi_n = layer_in @ g["w_ih"][2] + g["b_ih"][2]
        gh_r = h_prev @ g["w_hh"][0] + g["b_hh"][0]
        gh_z = h_prev @ g["w_hh"][1] + g["b_hh"][1]
        gh_n = h_prev @ g["w_hh"][2] + g["b_hh"][2]
        r = jax.nn.sigmoid(gi_r + gh_r)
        z = jax.nn.sigmoid(gi_z + gh_z)
        n = jnp.tanh(gi_n + r * gh_n)
        h_new = (1.0 - z) * n + z * h_prev
        new_hidden.append(h_new)
        layer_in = h_new
    new_hidden = jnp.stack(new_hidden, axis=0)
    y = layer_in @ params["w1_t"] + params["b1"]
    y = y @ params["w2_t"] + params["b2"]
    pred = y @ params["w3_t"] + params["b3"]
    return pred, new_hidden


# ----------------------------------------------------------------------------
# Deterministic parameter construction (torch-layout notes):
#   attn_w   == Attention.W.weight (out, in); used as enc @ W.T == (h0 @ W) . enc
#   w_ih[g]  == weight_ih_l{l}[g*H2:(g+1)*H2, :].T  (gate-split, pre-transposed)
#   w{1,2,3}_t == embedding2vocab{1,2,3}.weight.T
# ----------------------------------------------------------------------------
def make_params(key, *, cn_vocab_size, emb_dim, hid_dim, n_layers, isatt):
    H2 = hid_dim * 2
    input_dim = emb_dim + H2 if isatt else emb_dim
    keys = jax.random.split(key, 8 + n_layers)

    def rnd(k, shape, scale=0.1):
        return (scale * jax.random.normal(k, shape)).astype(jnp.float32)

    params = {
        "emb": rnd(keys[0], (cn_vocab_size, emb_dim)),
        "attn_w": rnd(keys[1], (H2, H2)),
        "w1_t": rnd(keys[2], (H2, 2 * H2)),
        "b1": rnd(keys[3], (2 * H2,)),
        "w2_t": rnd(keys[4], (2 * H2, 4 * H2)),
        "b2": rnd(keys[5], (4 * H2,)),
        "w3_t": rnd(keys[6], (4 * H2, cn_vocab_size)),
        "b3": rnd(keys[7], (cn_vocab_size,)),
    }
    gru = []
    for l in range(n_layers):
        din = input_dim if l == 0 else H2
        ka, kb, kc, kd = jax.random.split(keys[8 + l], 4)
        gru.append({
            "w_ih": rnd(ka, (3, din, H2)),
            "w_hh": rnd(kb, (3, H2, H2)),
            "b_ih": rnd(kc, (3, H2)),
            "b_hh": rnd(kd, (3, H2)),
        })
    params["gru"] = gru
    return params


if __name__ == "__main__":
    # Small, module-consistent shapes
    B = 2            # batch
    S = 8            # encoder sequence length
    hid_dim = 16     # -> decoder hidden = 2*hid_dim = 32
    emb_dim = 32
    n_layers = 2
    cn_vocab_size = 512
    isatt = True
    H2 = hid_dim * 2

    key = jax.random.PRNGKey(0)
    k_p, k_in, k_h, k_enc = jax.random.split(key, 4)

    params = make_params(k_p, cn_vocab_size=cn_vocab_size, emb_dim=emb_dim,
                         hid_dim=hid_dim, n_layers=n_layers, isatt=isatt)
    prepped = prepare_decoder(params, isatt=isatt, tile_v=512)

    input_ids = jax.random.randint(k_in, (B,), 0, cn_vocab_size)                  # torch `input`: [B]
    hidden = (0.1 * jax.random.normal(k_h, (n_layers, B, H2))).astype(jnp.float32)
    encoder_outputs = (0.1 * jax.random.normal(k_enc, (B, S, H2))).astype(jnp.float32)

    fwd = jax.jit(lambda ids, h, enc: decoder_forward(prepped, ids, h, enc))
    prediction, new_hidden = fwd(input_ids, hidden, encoder_outputs)
    jax.block_until_ready((prediction, new_hidden))

    pred_ref, hid_ref = decoder_forward_ref(params, input_ids, hidden,
                                            encoder_outputs, isatt=isatt)
    assert prediction.shape == (B, cn_vocab_size)
    assert new_hidden.shape == (n_layers, B, H2)
    # hidden path is full f32 (approx-reciprocal softmax only) -> tight tolerance;
    # prediction uses bf16 w3 / bf16 y2 LHS with f32 accumulation -> relaxed tolerance.
    assert jnp.allclose(new_hidden, hid_ref, atol=1e-3, rtol=1e-3), \
        float(jnp.max(jnp.abs(new_hidden - hid_ref)))
    assert jnp.allclose(prediction, pred_ref, atol=2e-2, rtol=2e-2), \
        float(jnp.max(jnp.abs(prediction - pred_ref)))

    print("KERNEL_OK")
</pallas_src>

<mosaic_0001>
module attributes {stable_mosaic.version = 11 : i64} {
  func.func @_vocab_proj_kernel(%arg0: i32, %arg1: memref<8x128xf32, #tpu.memory_space<vmem>>, %arg2: memref<128x512xbf16, #tpu.memory_space<vmem>>, %arg3: memref<1x512xf32, #tpu.memory_space<vmem>>, %arg4: memref<8x512xf32, #tpu.memory_space<vmem>>) attributes {dimension_semantics = [#tpu.dimension_semantics<parallel>], iteration_bounds = array<i64: 1>, scalar_prefetch = 0 : i64, scratch_operands = 0 : i64, tpu.core_type = #tpu.core_type<tc>, window_params = [{pipeline_mode = #tpu.pipeline_mode<synchronous>, transform_indices = @transform_0, window_bounds = array<i64: 8, 128>}, {transform_indices = @transform_1, window_bounds = array<i64: 128, 512>}, {transform_indices = @transform_2, window_bounds = array<i64: 1, 512>}, {transform_indices = @transform_3, window_bounds = array<i64: 8, 512>}]} {
    %c0 = arith.constant 0 : index
    %c0_0 = arith.constant 0 : index
    %0 = vector.load %arg1[%c0, %c0_0] : memref<8x128xf32, #tpu.memory_space<vmem>>, vector<8x128xf32>
    %1 = arith.truncf %0 : vector<8x128xf32> to vector<8x128xbf16>
    %c0_1 = arith.constant 0 : index
    %c0_2 = arith.constant 0 : index
    %2 = vector.load %arg2[%c0_1, %c0_2] : memref<128x512xbf16, #tpu.memory_space<vmem>>, vector<128x512xbf16>
    %cst = arith.constant dense<0.000000e+00> : vector<8x512xf32>
    %3 = tpu.matmul %1, %2, %cst {dimension_numbers = #tpu.dot_dimension_numbers<[1], [0], [0], [1], [0, 0, 1, 1], [], []>} : vector<8x128xbf16>, vector<128x512xbf16>, vector<8x512xf32> -> vector<8x512xf32>
    %c0_3 = arith.constant 0 : index
    %c0_4 = arith.constant 0 : index
    %4 = vector.load %arg3[%c0_3, %c0_4] : memref<1x512xf32, #tpu.memory_space<vmem>>, vector<1x512xf32>
    %5 = vector.broadcast %4 : vector<1x512xf32> to vector<8x512xf32>
    %6 = arith.addf %3, %5 : vector<8x512xf32>
    %c0_5 = arith.constant 0 : index
    %c0_6 = arith.constant 0 : index
    %7 = vector.load %arg4[%c0_5, %c0_6] : memref<8x512xf32, #tpu.memory_space<vmem>>, vector<8x512xf32>
    tpu.vector_store %arg4[%c0_5, %c0_6], %6 {strides = array<i32>} : memref<8x512xf32, #tpu.memory_space<vmem>>, vector<8x512xf32>,
    return
  }
  func.func @transform_0(%arg0: i32) -> (i32, i32) {
    %c0_i32 = arith.constant 0 : i32
    %c0_i32_0 = arith.constant 0 : i32
    %c0_i32_1 = arith.constant 0 : i32
    return %c0_i32, %c0_i32_0 : i32, i32
  }
  func.func @transform_1(%arg0: i32) -> (i32, i32) {
    %c0_i32 = arith.constant 0 : i32
    %c0_i32_0 = arith.constant 0 : i32
    return %c0_i32, %arg0 : i32, i32
  }
  func.func @transform_2(%arg0: i32) -> (i32, i32) {
    %c0_i32 = arith.constant 0 : i32
    %c0_i32_0 = arith.constant 0 : i32
    return %c0_i32, %arg0 : i32, i32
  }
  func.func @transform_3(%arg0: i32) -> (i32, i32) {
    %c0_i32 = arith.constant 0 : i32
    %c0_i32_0 = arith.constant 0 : i32
    return %c0_i32, %arg0 : i32, i32
  }
}

module attributes {stable_mosaic.version = 11 : i64} {
  func.func @_prologue_kernel(%arg0: i32, %arg1: memref<8x32xf32, #tpu.memory_space<vmem>>, %arg2: memref<2x8x32xf32, #tpu.memory_space<vmem>>, %arg3: memref<8x8x32xf32, #tpu.memory_space<vmem>>, %arg4: memref<32x32xf32, #tpu.memory_space<vmem>>, %arg5: memref<3x32x32xf32, #tpu.memory_space<vmem>>, %arg6: memref<3x32x32xf32, #tpu.memory_space<vmem>>, %arg7: memref<3x32x32xf32, #tpu.memory_space<vmem>>, %arg8: memref<3x1x32xf32, #tpu.memory_space<vmem>>, %arg9: memref<3x1x32xf32, #tpu.memory_space<vmem>>, %arg10: memref<3x32x32xf32, #tpu.memory_space<vmem>>, %arg11: memref<3x32x32xf32, #tpu.memory_space<vmem>>, %arg12: memref<3x1x32xf32, #tpu.memory_space<vmem>>, %arg13: memref<3x1x32xf32, #tpu.memory_space<vmem>>, %arg14: memref<32x64xf32, #tpu.memory_space<vmem>>, %arg15: memref<1x64xf32, #tpu.memory_space<vmem>>, %arg16: memref<64x128xf32, #tpu.memory_space<vmem>>, %arg17: memref<1x128xf32, #tpu.memory_space<vmem>>, %arg18: memref<8x128xf32, #tpu.memory_space<vmem>>, %arg19: memref<2x8x32xf32, #tpu.memory_space<vmem>>) attributes {dimension_semantics = [#tpu.dimension_semantics<arbitrary>], iteration_bounds = array<i64: 1>, scalar_prefetch = 0 : i64, scratch_operands = 0 : i64, tpu.core_type = #tpu.core_type<tc>, window_params = [{pipeline_mode = #tpu.pipeline_mode<synchronous>, transform_indices = @transform_0, window_bounds = array<i64: 8, 32>}, {pipeline_mode = #tpu.pipeline_mode<synchronous>, transform_indices = @transform_1, window_bounds = array<i64: 2, 8, 32>}, {pipeline_mode = #tpu.pipeline_mode<synchronous>, transform_indices = @transform_2, window_bounds = array<i64: 8, 8, 32>}, {pipeline_mode = #tpu.pipeline_mode<synchronous>, transform_indices = @transform_3, window_bounds = array<i64: 32, 32>}, {pipeline_mode = #tpu.pipeline_mode<synchronous>, transform_indices = @transform_4, window_bounds = array<i64: 3, 32, 32>}, {pipeline_mode = #tpu.pipeline_mode<synchronous>, transform_indices = @transform_5, window_bounds = array<i64: 3, 32, 32>}, {pipeline_mode = #tpu.pipeline_mode<synchronous>, transform_indices = @transform_6, window_bounds = array<i64: 3, 32, 32>}, {pipeline_mode = #tpu.pipeline_mode<synchronous>, transform_indices = @transform_7, window_bounds = array<i64: 3, 1, 32>}, {pipeline_mode = #tpu.pipeline_mode<synchronous>, transform_indices = @transform_8, window_bounds = array<i64: 3, 1, 32>}, {pipeline_mode = #tpu.pipeline_mode<synchronous>, transform_indices = @transform_9, window_bounds = array<i64: 3, 32, 32>}, {pipeline_mode = #tpu.pipeline_mode<synchronous>, transform_indices = @transform_10, window_bounds = array<i64: 3, 32, 32>}, {pipeline_mode = #tpu.pipeline_mode<synchronous>, transform_indices = @transform_11, window_bounds = array<i64: 3, 1, 32>}, {pipeline_mode = #tpu.pipeline_mode<synchronous>, transform_indices = @transform_12, window_bounds = array<i64: 3, 1, 32>}, {pipeline_mode = #tpu.pipeline_mode<synchronous>, transform_indices = @transform_13, window_bounds = array<i64: 32, 64>}, {pipeline_mode = #tpu.pipeline_mode<synchronous>, transform_indices = @transform_14, window_bounds = array<i64: 1, 64>}, {pipeline_mode = #tpu.pipeline_mode<synchronous>, transform_indices = @transform_15, window_bounds = array<i64: 64, 128>}, {pipeline_mode = #tpu.pipeline_mode<synchronous>, transform_indices = @transform_16, window_bounds = array<i64: 1, 128>}, {pipeline_mode = #tpu.pipeline_mode<synchronous>, transform_indices = @transform_17, window_bounds = array<i64: 8, 128>}, {pipeline_mode = #tpu.pipeline_mode<synchronous>, transform_indices = @transform_18, window_bounds = array<i64: 2, 8, 32>}]} {
    %c0 = arith.constant 0 : index
    %c0_0 = arith.constant 0 : index
    %0 = vector.load %arg1[%c0, %c0_0] : memref<8x32xf32, #tpu.memory_space<vmem>>, vector<8x32xf32>
    %c0_1 = arith.constant 0 : index
    %c0_2 = arith.constant 0 : index
    %c0_3 = arith.constant 0 : index
    %1 = vector.load %arg3[%c0_1, %c0_2, %c0_3] : memref<8x8x32xf32, #tpu.memory_space<vmem>>, vector<8x8x32xf32>
    %c0_4 = arith.constant 0 : index
    %c0_5 = arith.constant 0 : index
    %c0_6 = arith.constant 0 : index
    %2 = vector.load %arg2[%c0_4, %c0_5, %c0_6] : memref<2x8x32xf32, #tpu.memory_space<vmem>>, vector<1x8x32xf32>
    %3 = vector.shape_cast %2 : vector<1x8x32xf32> to vector<8x32xf32>
    %c0_7 = arith.constant 0 : index
    %c0_8 = arith.constant 0 : index
    %4 = vector.load %arg4[%c0_7, %c0_8] : memref<32x32xf32, #tpu.memory_space<vmem>>, vector<32x32xf32>
    %cst = arith.constant dense<0.000000e+00> : vector<8x32xf32>
    %5 = tpu.matmul %3, %4, %cst {dimension_numbers = #tpu.dot_dimension_numbers<[1], [0], [0], [1], [0, 0, 1, 1], [], []>} : vector<8x32xf32>, vector<32x32xf32>, vector<8x32xf32> -> vector<8x32xf32>
    %6 = vector.shape_cast %5 : vector<8x32xf32> to vector<8x1x32xf32>
    %7 = vector.broadcast %6 : vector<8x1x32xf32> to vector<8x8x32xf32>
    %8 = arith.mulf %1, %7 : vector<8x8x32xf32>
    %cst_9 = arith.constant dense<0.000000e+00> : vector<8x8xf32>
    %9 = vector.multi_reduction <add>, %8, %cst_9 [2] : vector<8x8x32xf32> to vector<8x8xf32>
    %cst_10 = arith.constant dense<0xFF800000> : vector<8xf32>
    %10 = vector.multi_reduction <maximumf>, %9, %cst_10 [1] : vector<8x8xf32> to vector<8xf32>
    %11 = vector.shape_cast %10 : vector<8xf32> to vector<8x1xf32>
    %12 = vector.broadcast %11 : vector<8x1xf32> to vector<8x8xf32>
    %13 = arith.subf %9, %12 : vector<8x8xf32>
    %14 = math.exp %13 : vector<8x8xf32>
    %cst_11 = arith.constant dense<0.000000e+00> : vector<8xf32>
    %15 = vector.multi_reduction <add>, %14, %cst_11 [1] : vector<8x8xf32> to vector<8xf32>
    %16 = vector.shape_cast %15 : vector<8xf32> to vector<8x1xf32>
    %17 = tpu.reciprocal %16 {approx = true} : vector<8x1xf32> -> vector<8x1xf32>
    %18 = vector.broadcast %17 : vector<8x1xf32> to vector<8x8xf32>
    %19 = arith.mulf %14, %18 : vector<8x8xf32>
    %20 = vector.shape_cast %19 : vector<8x8xf32> to vector<8x8x1xf32>
    %21 = vector.broadcast %20 : vector<8x8x1xf32> to vector<8x8x32xf32>
    %22 = arith.mulf %21, %1 : vector<8x8x32xf32>
    %cst_12 = arith.constant dense<0.000000e+00> : vector<8x32xf32>
    %23 = vector.multi_reduction <add>, %22, %cst_12 [1] : vector<8x8x32xf32> to vector<8x32xf32>
    %c0_13 = arith.constant 0 : index
    %c0_14 = arith.constant 0 : index
    %c0_15 = arith.constant 0 : index
    %24 = vector.load %arg2[%c0_13, %c0_14, %c0_15] : memref<2x8x32xf32, #tpu.memory_space<vmem>>, vector<1x8x32xf32>
    %25 = vector.shape_cast %24 : vector<1x8x32xf32> to vector<8x32xf32>
    %c0_16 = arith.constant 0 : index
    %c0_17 = arith.constant 0 : index
    %c0_18 = arith.constant 0 : index
    %26 = vector.load %arg5[%c0_16, %c0_17, %c0_18] : memref<3x32x32xf32, #tpu.memory_space<vmem>>, vector<1x32x32xf32>
    %27 = vector.shape_cast %26 : vector<1x32x32xf32> to vector<32x32xf32>
    %cst_19 = arith.constant dense<0.000000e+00> : vector<8x32xf32>
    %28 = tpu.matmul %0, %27, %cst_19 {dimension_numbers = #tpu.dot_dimension_numbers<[1], [0], [0], [1], [0, 0, 1, 1], [], []>} : vector<8x32xf32>, vector<32x32xf32>, vector<8x32xf32> -> vector<8x32xf32>
    %c0_20 = arith.constant 0 : index
    %c0_21 = arith.constant 0 : index
    %c0_22 = arith.constant 0 : index
    %29 = vector.load %arg6[%c0_20, %c0_21, %c0_22] : memref<3x32x32xf32, #tpu.memory_space<vmem>>, vector<1x32x32xf32>
    %30 = vector.shape_cast %29 : vector<1x32x32xf32> to vector<32x32xf32>
    %cst_23 = arith.constant dense<0.000000e+00> : vector<8x32xf32>
    %31 = tpu.matmul %23, %30, %cst_23 {dimension_numbers = #tpu.dot_dimension_numbers<[1], [0], [0], [1], [0, 0, 1, 1], [], []>} : vector<8x32xf32>, vector<32x32xf32>, vector<8x32xf32> -> vector<8x32xf32>
    %32 = arith.addf %28, %31 : vector<8x32xf32>
    %c0_24 = arith.constant 0 : index
    %c0_25 = arith.constant 0 : index
    %c0_26 = arith.constant 0 : index
    %33 = vector.load %arg8[%c0_24, %c0_25, %c0_26] : memref<3x1x32xf32, #tpu.memory_space<vmem>>, vector<1x1x32xf32>
    %34 = vector.shape_cast %33 : vector<1x1x32xf32> to vector<1x32xf32>
    %35 = vector.broadcast %34 : vector<1x32xf32> to vector<8x32xf32>
    %36 = arith.addf %32, %35 : vector<8x32xf32>
    %c1 = arith.constant 1 : index
    %c0_27 = arith.constant 0 : index
    %c0_28 = arith.constant 0 : index
    %37 = vector.load %arg5[%c1, %c0_27, %c0_28] : memref<3x32x32xf32, #tpu.memory_space<vmem>>, vector<1x32x32xf32>
    %38 = vector.shape_cast %37 : vector<1x32x32xf32> to vector<32x32xf32>
    %cst_29 = arith.constant dense<0.000000e+00> : vector<8x32xf32>
    %39 = tpu.matmul %0, %38, %cst_29 {dimension_numbers = #tpu.dot_dimension_numbers<[1], [0], [0], [1], [0, 0, 1, 1], [], []>} : vector<8x32xf32>, vector<32x32xf32>, vector<8x32xf32> -> vector<8x32xf32>
    %c1_30 = arith.constant 1 : index
    %c0_31 = arith.constant 0 : index
    %c0_32 = arith.constant 0 : index
    %40 = vector.load %arg6[%c1_30, %c0_31, %c0_32] : memref<3x32x32xf32, #tpu.memory_space<vmem>>, vector<1x32x32xf32>
    %41 = vector.shape_cast %40 : vector<1x32x32xf32> to vector<32x32xf32>
    %cst_33 = arith.constant dense<0.000000e+00> : vector<8x32xf32>
    %42 = tpu.matmul %23, %41, %cst_33 {dimension_numbers = #tpu.dot_dimension_numbers<[1], [0], [0], [1], [0, 0, 1, 1], [], []>} : vector<8x32xf32>, vector<32x32xf32>, vector<8x32xf32> -> vector<8x32xf32>
    %43 = arith.addf %39, %42 : vector<8x32xf32>
    %c1_34 = arith.constant 1 : index
    %c0_35 = arith.constant 0 : index
    %c0_36 = arith.constant 0 : index
    %44 = vector.load %arg8[%c1_34, %c0_35, %c0_36] : memref<3x1x32xf32, #tpu.memory_space<vmem>>, vector<1x1x32xf32>
    %45 = vector.shape_cast %44 : vector<1x1x32xf32> to vector<1x32xf32>
    %46 = vector.broadcast %45 : vector<1x32xf32> to vector<8x32xf32>
    %47 = arith.addf %43, %46 : vector<8x32xf32>
    %c2 = arith.constant 2 : index
    %c0_37 = arith.constant 0 : index
    %c0_38 = arith.constant 0 : index
    %48 = vector.load %arg5[%c2, %c0_37, %c0_38] : memref<3x32x32xf32, #tpu.memory_space<vmem>>, vector<1x32x32xf32>
    %49 = vector.shape_cast %48 : vector<1x32x32xf32> to vector<32x32xf32>
    %cst_39 = arith.constant dense<0.000000e+00> : vector<8x32xf32>
    %50 = tpu.matmul %0, %49, %cst_39 {dimension_numbers = #tpu.dot_dimension_numbers<[1], [0], [0], [1], [0, 0, 1, 1], [], []>} : vector<8x32xf32>, vector<32x32xf32>, vector<8x32xf32> -> vector<8x32xf32>
    %c2_40 = arith.constant 2 : index
    %c0_41 = arith.constant 0 : index
    %c0_42 = arith.constant 0 : index
    %51 = vector.load %arg6[%c2_40, %c0_41, %c0_42] : memref<3x32x32xf32, #tpu.memory_space<vmem>>, vector<1x32x32xf32>
    %52 = vector.shape_cast %51 : vector<1x32x32xf32> to vector<32x32xf32>
    %cst_43 = arith.constant dense<0.000000e+00> : vector<8x32xf32>
    %53 = tpu.matmul %23, %52, %cst_43 {dimension_numbers = #tpu.dot_dimension_numbers<[1], [0], [0], [1], [0, 0, 1, 1], [], []>} : vector<8x32xf32>, vector<32x32xf32>, vector<8x32xf32> -> vector<8x32xf32>
    %54 = arith.addf %50, %53 : vector<8x32xf32>
    %c2_44 = arith.constant 2 : index
    %c0_45 = arith.constant 0 : index
    %c0_46 = arith.constant 0 : index
    %55 = vector.load %arg8[%c2_44, %c0_45, %c0_46] : memref<3x1x32xf32, #tpu.memory_space<vmem>>, vector<1x1x32xf32>
    %56 = vector.shape_cast %55 : vector<1x1x32xf32> to vector<1x32xf32>
    %57 = vector.broadcast %56 : vector<1x32xf32> to vector<8x32xf32>
    %58 = arith.addf %54, %57 : vector<8x32xf32>
    %c0_47 = arith.constant 0 : index
    %c0_48 = arith.constant 0 : index
    %c0_49 = arith.constant 0 : index
    %59 = vector.load %arg7[%c0_47, %c0_48, %c0_49] : memref<3x32x32xf32, #tpu.memory_space<vmem>>, vector<1x32x32xf32>
    %60 = vector.shape_cast %59 : vector<1x32x32xf32> to vector<32x32xf32>
    %cst_50 = arith.constant dense<0.000000e+00> : vector<8x32xf32>
    %61 = tpu.matmul %25, %60, %cst_50 {dimension_numbers = #tpu.dot_dimension_numbers<[1], [0], [0], [1], [0, 0, 1, 1], [], []>} : vector<8x32xf32>, vector<32x32xf32>, vector<8x32xf32> -> vector<8x32xf32>
    %c0_51 = arith.constant 0 : index
    %c0_52 = arith.constant 0 : index
    %c0_53 = arith.constant 0 : index
    %62 = vector.load %arg9[%c0_51, %c0_52, %c0_53] : memref<3x1x32xf32, #tpu.memory_space<vmem>>, vector<1x1x32xf32>
    %63 = vector.shape_cast %62 : vector<1x1x32xf32> to vector<1x32xf32>
    %64 = vector.broadcast %63 : vector<1x32xf32> to vector<8x32xf32>
    %65 = arith.addf %61, %64 : vector<8x32xf32>
    %c1_54 = arith.constant 1 : index
    %c0_55 = arith.constant 0 : index
    %c0_56 = arith.constant 0 : index
    %66 = vector.load %arg7[%c1_54, %c0_55, %c0_56] : memref<3x32x32xf32, #tpu.memory_space<vmem>>, vector<1x32x32xf32>
    %67 = vector.shape_cast %66 : vector<1x32x32xf32> to vector<32x32xf32>
    %cst_57 = arith.constant dense<0.000000e+00> : vector<8x32xf32>
    %68 = tpu.matmul %25, %67, %cst_57 {dimension_numbers = #tpu.dot_dimension_numbers<[1], [0], [0], [1], [0, 0, 1, 1], [], []>} : vector<8x32xf32>, vector<32x32xf32>, vector<8x32xf32> -> vector<8x32xf32>
    %c1_58 = arith.constant 1 : index
    %c0_59 = arith.constant 0 : index
    %c0_60 = arith.constant 0 : index
    %69 = vector.load %arg9[%c1_58, %c0_59, %c0_60] : memref<3x1x32xf32, #tpu.memory_space<vmem>>, vector<1x1x32xf32>
    %70 = vector.shape_cast %69 : vector<1x1x32xf32> to vector<1x32xf32>
    %71 = vector.broadcast %70 : vector<1x32xf32> to vector<8x32xf32>
    %72 = arith.addf %68, %71 : vector<8x32xf32>
    %c2_61 = arith.constant 2 : index
    %c0_62 = arith.constant 0 : index
    %c0_63 = arith.constant 0 : index
    %73 = vector.load %arg7[%c2_61, %c0_62, %c0_63] : memref<3x32x32xf32, #tpu.memory_space<vmem>>, vector<1x32x32xf32>
    %74 = vector.shape_cast %73 : vector<1x32x32xf32> to vector<32x32xf32>
    %cst_64 = arith.constant dense<0.000000e+00> : vector<8x32xf32>
    %75 = tpu.matmul %25, %74, %cst_64 {dimension_numbers = #tpu.dot_dimension_numbers<[1], [0], [0], [1], [0, 0, 1, 1], [], []>} : vector<8x32xf32>, vector<32x32xf32>, vector<8x32xf32> -> vector<8x32xf32>
    %c2_65 = arith.constant 2 : index
    %c0_66 = arith.constant 0 : index
    %c0_67 = arith.constant 0 : index
    %76 = vector.load %arg9[%c2_65, %c0_66, %c0_67] : memref<3x1x32xf32, #tpu.memory_space<vmem>>, vector<1x1x32xf32>
    %77 = vector.shape_cast %76 : vector<1x1x32xf32> to vector<1x32xf32>
    %78 = vector.broadcast %77 : vector<1x32xf32> to vector<8x32xf32>
    %79 = arith.addf %75, %78 : vector<8x32xf32>
    %80 = arith.addf %36, %65 : vector<8x32xf32>
    %81 = arith.negf %80 : vector<8x32xf32>
    %82 = math.exp %81 : vector<8x32xf32>
    %cst_68 = arith.constant 1.000000e+00 : f32
    %83 = vector.broadcast %cst_68 : f32 to vector<8x32xf32>
    %84 = arith.addf %83, %82 : vector<8x32xf32>
    %85 = arith.divf %83, %84 : vector<8x32xf32>
    %86 = arith.addf %47, %72 : vector<8x32xf32>
    %87 = arith.negf %86 : vector<8x32xf32>
    %88 = math.exp %87 : vector<8x32xf32>
    %cst_69 = arith.constant 1.000000e+00 : f32
    %89 = vector.broadcast %cst_69 : f32 to vector<8x32xf32>
    %90 = arith.addf %89, %88 : vector<8x32xf32>
    %91 = arith.divf %89, %90 : vector<8x32xf32>
    %92 = arith.mulf %85, %79 : vector<8x32xf32>
    %93 = arith.addf %58, %92 : vector<8x32xf32>
    %94 = math.tanh %93 : vector<8x32xf32>
    %cst_70 = arith.constant 1.000000e+00 : f32
    %95 = vector.broadcast %cst_70 : f32 to vector<8x32xf32>
    %96 = arith.subf %95, %91 : vector<8x32xf32>
    %97 = arith.mulf %96, %94 : vector<8x32xf32>
    %98 = arith.mulf %91, %25 : vector<8x32xf32>
    %99 = arith.addf %97, %98 : vector<8x32xf32>
    %c0_71 = arith.constant 0 : index
    %c0_72 = arith.constant 0 : index
    %c0_73 = arith.constant 0 : index
    %100 = vector.load %arg19[%c0_71, %c0_72, %c0_73] : memref<2x8x32xf32, #tpu.memory_space<vmem>>, vector<1x8x32xf32>
    %101 = vector.shape_cast %100 : vector<1x8x32xf32> to vector<8x32xf32>
    %102 = vector.shape_cast %99 : vector<8x32xf32> to vector<1x8x32xf32>
    tpu.vector_store %arg19[%c0_71, %c0_72, %c0_73], %102 {strides = array<i32>} : memref<2x8x32xf32, #tpu.memory_space<vmem>>, vector<1x8x32xf32>,
    %c1_74 = arith.constant 1 : index
    %c0_75 = arith.constant 0 : index
    %c0_76 = arith.constant 0 : index
    %103 = vector.load %arg2[%c1_74, %c0_75, %c0_76] : memref<2x8x32xf32, #tpu.memory_space<vmem>>, vector<1x8x32xf32>
    %104 = vector.shape_cast %103 : vector<1x8x32xf32> to vector<8x32xf32>
    %c0_77 = arith.constant 0 : index
    %c0_78 = arith.constant 0 : index
    %c0_79 = arith.constant 0 : index
    %105 = vector.load %arg10[%c0_77, %c0_78, %c0_79] : memref<3x32x32xf32, #tpu.memory_space<vmem>>, vector<1x32x32xf32>
    %106 = vector.shape_cast %105 : vector<1x32x32xf32> to vector<32x32xf32>
    %cst_80 = arith.constant dense<0.000000e+00> : vector<8x32xf32>
    %107 = tpu.matmul %99, %106, %cst_80 {dimension_numbers = #tpu.dot_dimension_numbers<[1], [0], [0], [1], [0, 0, 1, 1], [], []>} : vector<8x32xf32>, vector<32x32xf32>, vector<8x32xf32> -> vector<8x32xf32>
    %c0_81 = arith.constant 0 : index
    %c0_82 = arith.constant 0 : index
    %c0_83 = arith.constant 0 : index
    %108 = vector.load %arg12[%c0_81, %c0_82, %c0_83] : memref<3x1x32xf32, #tpu.memory_space<vmem>>, vector<1x1x32xf32>
    %109 = vector.shape_cast %108 : vector<1x1x32xf32> to vector<1x32xf32>
    %110 = vector.broadcast %109 : vector<1x32xf32> to vector<8x32xf32>
    %111 = arith.addf %107, %110 : vector<8x32xf32>
    %c1_84 = arith.constant 1 : index
    %c0_85 = arith.constant 0 : index
    %c0_86 = arith.constant 0 : index
    %112 = vector.load %arg10[%c1_84, %c0_85, %c0_86] : memref<3x32x32xf32, #tpu.memory_space<vmem>>, vector<1x32x32xf32>
    %113 = vector.shape_cast %112 : vector<1x32x32xf32> to vector<32x32xf32>
    %cst_87 = arith.constant dense<0.000000e+00> : vector<8x32xf32>
    %114 = tpu.matmul %99, %113, %cst_87 {dimension_numbers = #tpu.dot_dimension_numbers<[1], [0], [0], [1], [0, 0, 1, 1], [], []>} : vector<8x32xf32>, vector<32x32xf32>, vector<8x32xf32> -> vector<8x32xf32>
    %c1_88 = arith.constant 1 : index
    %c0_89 = arith.constant 0 : index
    %c0_90 = arith.constant 0 : index
    %115 = vector.load %arg12[%c1_88, %c0_89, %c0_90] : memref<3x1x32xf32, #tpu.memory_space<vmem>>, vector<1x1x32xf32>
    %116 = vector.shape_cast %115 : vector<1x1x32xf32> to vector<1x32xf32>
    %117 = vector.broadcast %116 : vector<1x32xf32> to vector<8x32xf32>
    %118 = arith.addf %114, %117 : vector<8x32xf32>
    %c2_91 = arith.constant 2 : index
    %c0_92 = arith.constant 0 : index
    %c0_93 = arith.constant 0 : index
    %119 = vector.load %arg10[%c2_91, %c0_92, %c0_93] : memref<3x32x32xf32, #tpu.memory_space<vmem>>, vector<1x32x32xf32>
    %120 = vector.shape_cast %119 : vector<1x32x32xf32> to vector<32x32xf32>
    %cst_94 = arith.constant dense<0.000000e+00> : vector<8x32xf32>
    %121 = tpu.matmul %99, %120, %cst_94 {dimension_numbers = #tpu.dot_dimension_numbers<[1], [0], [0], [1], [0, 0, 1, 1], [], []>} : vector<8x32xf32>, vector<32x32xf32>, vector<8x32xf32> -> vector<8x32xf32>
    %c2_95 = arith.constant 2 : index
    %c0_96 = arith.constant 0 : index
    %c0_97 = arith.constant 0 : index
    %122 = vector.load %arg12[%c2_95, %c0_96, %c0_97] : memref<3x1x32xf32, #tpu.memory_space<vmem>>, vector<1x1x32xf32>
    %123 = vector.shape_cast %122 : vector<1x1x32xf32> to vector<1x32xf32>
    %124 = vector.broadcast %123 : vector<1x32xf32> to vector<8x32xf32>
    %125 = arith.addf %121, %124 : vector<8x32xf32>
    %c0_98 = arith.constant 0 : index
    %c0_99 = arith.constant 0 : index
    %c0_100 = arith.constant 0 : index
    %126 = vector.load %arg11[%c0_98, %c0_99, %c0_100] : memref<3x32x32xf32, #tpu.memory_space<vmem>>, vector<1x32x32xf32>
    %127 = vector.shape_cast %126 : vector<1x32x32xf32> to vector<32x32xf32>
    %cst_101 = arith.constant dense<0.000000e+00> : vector<8x32xf32>
    %128 = tpu.matmul %104, %127, %cst_101 {dimension_numbers = #tpu.dot_dimension_numbers<[1], [0], [0], [1], [0, 0, 1, 1], [], []>} : vector<8x32xf32>, vector<32x32xf32>, vector<8x32xf32> -> vector<8x32xf32>
    %c0_102 = arith.constant 0 : index
    %c0_103 = arith.constant 0 : index
    %c0_104 = arith.constant 0 : index
    %129 = vector.load %arg13[%c0_102, %c0_103, %c0_104] : memref<3x1x32xf32, #tpu.memory_space<vmem>>, vector<1x1x32xf32>
    %130 = vector.shape_cast %129 : vector<1x1x32xf32> to vector<1x32xf32>
    %131 = vector.broadcast %130 : vector<1x32xf32> to vector<8x32xf32>
    %132 = arith.addf %128, %131 : vector<8x32xf32>
    %c1_105 = arith.constant 1 : index
    %c0_106 = arith.constant 0 : index
    %c0_107 = arith.constant 0 : index
    %133 = vector.load %arg11[%c1_105, %c0_106, %c0_107] : memref<3x32x32xf32, #tpu.memory_space<vmem>>, vector<1x32x32xf32>
    %134 = vector.shape_cast %133 : vector<1x32x32xf32> to vector<32x32xf32>
    %cst_108 = arith.constant dense<0.000000e+00> : vector<8x32xf32>
    %135 = tpu.matmul %104, %134, %cst_108 {dimension_numbers = #tpu.dot_dimension_numbers<[1], [0], [0], [1], [0, 0, 1, 1], [], []>} : vector<8x32xf32>, vector<32x32xf32>, vector<8x32xf32> -> vector<8x32xf32>
    %c1_109 = arith.constant 1 : index
    %c0_110 = arith.constant 0 : index
    %c0_111 = arith.constant 0 : index
    %136 = vector.load %arg13[%c1_109, %c0_110, %c0_111] : memref<3x1x32xf32, #tpu.memory_space<vmem>>, vector<1x1x32xf32>
    %137 = vector.shape_cast %136 : vector<1x1x32xf32> to vector<1x32xf32>
    %138 = vector.broadcast %137 : vector<1x32xf32> to vector<8x32xf32>
    %139 = arith.addf %135, %138 : vector<8x32xf32>
    %c2_112 = arith.constant 2 : index
    %c0_113 = arith.constant 0 : index
    %c0_114 = arith.constant 0 : index
    %140 = vector.load %arg11[%c2_112, %c0_113, %c0_114] : memref<3x32x32xf32, #tpu.memory_space<vmem>>, vector<1x32x32xf32>
    %141 = vector.shape_cast %140 : vector<1x32x32xf32> to vector<32x32xf32>
    %cst_115 = arith.constant dense<0.000000e+00> : vector<8x32xf32>
    %142 = tpu.matmul %104, %141, %cst_115 {dimension_numbers = #tpu.dot_dimension_numbers<[1], [0], [0], [1], [0, 0, 1, 1], [], []>} : vector<8x32xf32>, vector<32x32xf32>, vector<8x32xf32> -> vector<8x32xf32>
    %c2_116 = arith.constant 2 : index
    %c0_117 = arith.constant 0 : index
    %c0_118 = arith.constant 0 : index
    %143 = vector.load %arg13[%c2_116, %c0_117, %c0_118] : memref<3x1x32xf32, #tpu.memory_space<vmem>>, vector<1x1x32xf32>
    %144 = vector.shape_cast %143 : vector<1x1x32xf32> to vector<1x32xf32>
    %145 = vector.broadcast %144 : vector<1x32xf32> to vector<8x32xf32>
    %146 = arith.addf %142, %145 : vector<8x32xf32>
    %147 = arith.addf %111, %132 : vector<8x32xf32>
    %148 = arith.negf %147 : vector<8x32xf32>
    %149 = math.exp %148 : vector<8x32xf32>
    %cst_119 = arith.constant 1.000000e+00 : f32
    %150 = vector.broadcast %cst_119 : f32 to vector<8x32xf32>
    %151 = arith.addf %150, %149 : vector<8x32xf32>
    %152 = arith.divf %150, %151 : vector<8x32xf32>
    %153 = arith.addf %118, %139 : vector<8x32xf32>
    %154 = arith.negf %153 : vector<8x32xf32>
    %155 = math.exp %154 : vector<8x32xf32>
    %cst_120 = arith.constant 1.000000e+00 : f32
    %156 = vector.broadcast %cst_120 : f32 to vector<8x32xf32>
    %157 = arith.addf %156, %155 : vector<8x32xf32>
    %158 = arith.divf %156, %157 : vector<8x32xf32>
    %159 = arith.mulf %152, %146 : vector<8x32xf32>
    %160 = arith.addf %125, %159 : vector<8x32xf32>
    %161 = math.tanh %160 : vector<8x32xf32>
    %cst_121 = arith.constant 1.000000e+00 : f32
    %162 = vector.broadcast %cst_121 : f32 to vector<8x32xf32>
    %163 = arith.subf %162, %158 : vector<8x32xf32>
    %164 = arith.mulf %163, %161 : vector<8x32xf32>
    %165 = arith.mulf %158, %104 : vector<8x32xf32>
    %166 = arith.addf %164, %165 : vector<8x32xf32>
    %c1_122 = arith.constant 1 : index
    %c0_123 = arith.constant 0 : index
    %c0_124 = arith.constant 0 : index
    %167 = vector.load %arg19[%c1_122, %c0_123, %c0_124] : memref<2x8x32xf32, #tpu.memory_space<vmem>>, vector<1x8x32xf32>
    %168 = vector.shape_cast %167 : vector<1x8x32xf32> to vector<8x32xf32>
    %169 = vector.shape_cast %166 : vector<8x32xf32> to vector<1x8x32xf32>
    tpu.vector_store %arg19[%c1_122, %c0_123, %c0_124], %169 {strides = array<i32>} : memref<2x8x32xf32, #tpu.memory_space<vmem>>, vector<1x8x32xf32>,
    %c0_125 = arith.constant 0 : index
    %c0_126 = arith.constant 0 : index
    %170 = vector.load %arg14[%c0_125, %c0_126] : memref<32x64xf32, #tpu.memory_space<vmem>>, vector<32x64xf32>
    %cst_127 = arith.constant dense<0.000000e+00> : vector<8x64xf32>
    %171 = tpu.matmul %166, %170, %cst_127 {dimension_numbers = #tpu.dot_dimension_numbers<[1], [0], [0], [1], [0, 0, 1, 1], [], []>} : vector<8x32xf32>, vector<32x64xf32>, vector<8x64xf32> -> vector<8x64xf32>
    %c0_128 = arith.constant 0 : index
    %c0_129 = arith.constant 0 : index
    %172 = vector.load %arg15[%c0_128, %c0_129] : memref<1x64xf32, #tpu.memory_space<vmem>>, vector<1x64xf32>
    %173 = vector.broadcast %172 : vector<1x64xf32> to vector<8x64xf32>
    %174 = arith.addf %171, %173 : vector<8x64xf32>
    %c0_130 = arith.constant 0 : index
    %c0_131 = arith.constant 0 : index
    %175 = vector.load %arg16[%c0_130, %c0_131] : memref<64x128xf32, #tpu.memory_space<vmem>>, vector<64x128xf32>
    %cst_132 = arith.constant dense<0.000000e+00> : vector<8x128xf32>
    %176 = tpu.matmul %174, %175, %cst_132 {dimension_numbers = #tpu.dot_dimension_numbers<[1], [0], [0], [1], [0, 0, 1, 1], [], []>} : vector<8x64xf32>, vector<64x128xf32>, vector<8x128xf32> -> vector<8x128xf32>
    %c0_133 = arith.constant 0 : index
    %c0_134 = arith.constant 0 : index
    %177 = vector.load %arg17[%c0_133, %c0_134] : memref<1x128xf32, #tpu.memory_space<vmem>>, vector<1x128xf32>
    %178 = vector.broadcast %177 : vector<1x128xf32> to vector<8x128xf32>
    %179 = arith.addf %176, %178 : vector<8x128xf32>
    %c0_135 = arith.constant 0 : index
    %c0_136 = arith.constant 0 : index
    %180 = vector.load %arg18[%c0_135, %c0_136] : memref<8x128xf32, #tpu.memory_space<vmem>>, vector<8x128xf32>
    tpu.vector_store %arg18[%c0_135, %c0_136], %179 {strides = array<i32>} : memref<8x128xf32, #tpu.memory_space<vmem>>, vector<8x128xf32>,
    return
  }
  func.func @transform_0(%arg0: i32) -> (i32, i32) {
    %c0_i32 = arith.constant 0 : i32
    %c0_i32_0 = arith.constant 0 : i32
    %c0_i32_1 = arith.constant 0 : i32
    return %c0_i32, %c0_i32_0 : i32, i32
  }
  func.func @transform_1(%arg0: i32) -> (i32, i32, i32) {
    %c0_i32 = arith.constant 0 : i32
    %c0_i32_0 = arith.constant 0 : i32
    %c0_i32_1 = arith.constant 0 : i32
    %c0_i32_2 = arith.constant 0 : i32
    return %c0_i32, %c0_i32_0, %c0_i32_1 : i32, i32, i32
  }
  func.func @transform_2(%arg0: i32) -> (i32, i32, i32) {
    %c0_i32 = arith.constant 0 : i32
    %c0_i32_0 = arith.constant 0 : i32
    %c0_i32_1 = arith.constant 0 : i32
    %c0_i32_2 = arith.constant 0 : i32
    return %c0_i32, %c0_i32_0, %c0_i32_1 : i32, i32, i32
  }
  func.func @transform_3(%arg0: i32) -> (i32, i32) {
    %c0_i32 = arith.constant 0 : i32
    %c0_i32_0 = arith.constant 0 : i32
    %c0_i32_1 = arith.constant 0 : i32
    return %c0_i32, %c0_i32_0 : i32, i32
  }
  func.func @transform_4(%arg0: i32) -> (i32, i32, i32) {
    %c0_i32 = arith.constant 0 : i32
    %c0_i32_0 = arith.constant 0 : i32
    %c0_i32_1 = arith.constant 0 : i32
    %c0_i32_2 = arith.constant 0 : i32
    return %c0_i32, %c0_i32_0, %c0_i32_1 : i32, i32, i32
  }
  func.func @transform_5(%arg0: i32) -> (i32, i32, i32) {
    %c0_i32 = arith.constant 0 : i32
    %c0_i32_0 = arith.constant 0 : i32
    %c0_i32_1 = arith.constant 0 : i32
    %c0_i32_2 = arith.constant 0 : i32
    return %c0_i32, %c0_i32_0, %c0_i32_1 : i32, i32, i32
  }
  func.func @transform_6(%arg0: i32) -> (i32, i32, i32) {
    %c0_i32 = arith.constant 0 : i32
    %c0_i32_0 = arith.constant 0 : i32
    %c0_i32_1 = arith.constant 0 : i32
    %c0_i32_2 = arith.constant 0 : i32
    return %c0_i32, %c0_i32_0, %c0_i32_1 : i32, i32, i32
  }
  func.func @transform_7(%arg0: i32) -> (i32, i32, i32) {
    %c0_i32 = arith.constant 0 : i32
    %c0_i32_0 = arith.constant 0 : i32
    %c0_i32_1 = arith.constant 0 : i32
    %c0_i32_2 = arith.constant 0 : i32
    return %c0_i32, %c0_i32_0, %c0_i32_1 : i32, i32, i32
  }
  func.func @transform_8(%arg0: i32) -> (i32, i32, i32) {
    %c0_i32 = arith.constant 0 : i32
    %c0_i32_0 = arith.constant 0 : i32
    %c0_i32_1 = arith.constant 0 : i32
    %c0_i32_2 = arith.constant 0 : i32
    return %c0_i32, %c0_i32_0, %c0_i32_1 : i32, i32, i32
  }
  func.func @transform_9(%arg0: i32) -> (i32, i32, i32) {
    %c0_i32 = arith.constant 0 : i32
    %c0_i32_0 = arith.constant 0 : i32
    %c0_i32_1 = arith.constant 0 : i32
    %c0_i32_2 = arith.constant 0 : i32
    return %c0_i32, %c0_i32_0, %c0_i32_1 : i32, i32, i32
  }
  func.func @transform_10(%arg0: i32) -> (i32, i32, i32) {
    %c0_i32 = arith.constant 0 : i32
    %c0_i32_0 = arith.constant 0 : i32
    %c0_i32_1 = arith.constant 0 : i32
    %c0_i32_2 = arith.constant 0 : i32
    return %c0_i32, %c0_i32_0, %c0_i32_1 : i32, i32, i32
  }
  func.func @transform_11(%arg0: i32) -> (i32, i32, i32) {
    %c0_i32 = arith.constant 0 : i32
    %c0_i32_0 = arith.constant 0 : i32
    %c0_i32_1 = arith.constant 0 : i32
    %c0_i32_2 = arith.constant 0 : i32
    return %c0_i32, %c0_i32_0, %c0_i32_1 : i32, i32, i32
  }
  func.func @transform_12(%arg0: i32) -> (i32, i32, i32) {
    %c0_i32 = arith.constant 0 : i32
    %c0_i32_0 = arith.constant 0 : i32
    %c0_i32_1 = arith.constant 0 : i32
    %c0_i32_2 = arith.constant 0 : i32
    return %c0_i32, %c0_i32_0, %c0_i32_1 : i32, i32, i32
  }
  func.func @transform_13(%arg0: i32) -> (i32, i32) {
    %c0_i32 = arith.constant 0 : i32
    %c0_i32_0 = arith.constant 0 : i32
    %c0_i32_1 = arith.constant 0 : i32
    return %c0_i32, %c0_i32_0 : i32, i32
  }
  func.func @transform_14(%arg0: i32) -> (i32, i32) {
    %c0_i32 = arith.constant 0 : i32
    %c0_i32_0 = arith.constant 0 : i32
    %c0_i32_1 = arith.constant 0 : i32
    return %c0_i32, %c0_i32_0 : i32, i32
  }
  func.func @transform_15(%arg0: i32) -> (i32, i32) {
    %c0_i32 = arith.constant 0 : i32
    %c0_i32_0 = arith.constant 0 : i32
    %c0_i32_1 = arith.constant 0 : i32
    return %c0_i32, %c0_i32_0 : i32, i32
  }
  func.func @transform_16(%arg0: i32) -> (i32, i32) {
    %c0_i32 = arith.constant 0 : i32
    %c0_i32_0 = arith.constant 0 : i32
    %c0_i32_1 = arith.constant 0 : i32
    return %c0_i32, %c0_i32_0 : i32, i32
  }
  func.func @transform_17(%arg0: i32) -> (i32, i32) {
    %c0_i32 = arith.constant 0 : i32
    %c0_i32_0 = arith.constant 0 : i32
    %c0_i32_1 = arith.constant 0 : i32
    return %c0_i32, %c0_i32_0 : i32, i32
  }
  func.func @transform_18(%arg0: i32) -> (i32, i32, i32) {
    %c0_i32 = arith.constant 0 : i32
    %c0_i32_0 = arith.constant 0 : i32
    %c0_i32_1 = arith.constant 0 : i32
    %c0_i32_2 = arith.constant 0 : i32
    return %c0_i32, %c0_i32_0, %c0_i32_1 : i32, i32, i32
  }
}

</mosaic_0001>

<bundles_post_ra>
// kernel: _lambda_.3
= control target key start
LH: loop header
LB: loop body
LE: loop exit
PB: predicated region body
PF: predicated region fallthrough
CT: control target
= control target key end

     0   :  { %8 = vsyncpa [#allocation3], 0  ;;  %s484_s15 = smov [#allocation2]   ;;  %s485_s17 = smov 256   ;;  %s528_s0 = inlined_call_operand.vmem [shape: f32[8,128], index: 0, kind: input, shape index: {}]   ;;  %s529_s1 = inlined_call_operand.hbm [shape: bf16[128,512], index: 1, kind: input, shape index: {}]   ;;  %s530_s2 = inlined_call_operand.vmem [shape: f32[1,512], index: 2, kind: input, shape index: {}]   ;;  %s531_s3 = inlined_call_operand.vmem [shape: f32[8,512], index: 3, kind: output, shape index: {}]  }
   0x1   :  { %s15_s14 = sshll.u32 %s529_s1, 4  ;;  %s17_s16 = sshll.u32 %s484_s15, 4  ;;  %s16_s14 = int_to_ptr.hbm [resolvable:$true] %s15_s14  ;;  %s18_s16 = int_to_ptr.vmem [resolvable:$true] %s17_s16 }
   0x2   :  { %s486_s18 = smov 16  }
   0x3   :  { %23 = dma.hbm_to_vmem [thread:$0]  %s16_s14, 4096, %s18_s16, [#allocation3], %s485_s17, %s485_s17, %s486_s18  }
   0x4   :  { %482 = dma.done.wait [#allocation3], 4096  }
   0x5   :  { %483 = vsyncadd [#allocation3], 4294963200  ;;  %v409_v0 = vld [vmem:[#allocation2 + $0xe0] sm:$0xf]  ;;  %v453_v1 = vld [vmem:[#allocation2 + $0xec] sm:$0xf0] }
   0x6   :  { %v451_v2 = vld [vmem:[#allocation2 + $0xe4] sm:$0xf]  ;;  %v410_v3 = vor.u32 %v453_v1, %v409_v0  ;;  %v411_v4 = vld [vmem:[#allocation2 + $0xf0] sm:$0xf0]  ;;  %v417_v5 = vld [vmem:[#allocation2 + $0xe8] sm:$0xf] }
   0x7   :  { %v454_v6 = vld [vmem:[#allocation2 + $0xf4] sm:$0xf0]  ;;  %v414_v7 = vor.u32 %v451_v2, %v411_v4  ;;  %v452_v9 = vld [vmem:[#allocation2 + $0xec] sm:$0xf]  ;;  %v419_v10 = vld [vmem:[#allocation2 + $0xf8] sm:$0xf0] }
   0x8   :  { %v418_v8 = vor.u32 %v454_v6, %v417_v5  ;;  %v393_v11 = vld [vmem:[#allocation2 + $0xc0] sm:$0xf]  ;;  %234 = vmatpush.bf16.msra.mxu0 %v410_v3  ;;  %v422_v12 = vor.u32 %v452_v9, %v419_v10  ;;  %v449_v13 = vld [vmem:[#allocation2 + $0xcc] sm:$0xf0]  ;;  %v447_v14 = vld [vmem:[#allocation2 + $0xc4] sm:$0xf] }
   0x9   :  { %v395_v15 = vld [vmem:[#allocation2 + $0xd0] sm:$0xf0]  ;;  %247 = vmatpush.bf16.msra.mxu1 %v414_v7  ;;  %v394_v16 = vor.u32 %v449_v13, %v393_v11  ;;  %v401_v18 = vld [vmem:[#allocation2 + $0xc8] sm:$0xf]  ;;  %v450_v19 = vld [vmem:[#allocation2 + $0xd4] sm:$0xf0] }
   0xa   :  { %260 = vmatpush.bf16.msra.mxu2 %v418_v8  ;;  %v398_v17 = vor.u32 %v447_v14, %v395_v15  ;;  %v448_v20 = vld [vmem:[#allocation2 + $0xcc] sm:$0xf]  ;;  %273 = vmatpush.bf16.msra.mxu3 %v422_v12  ;;  %v402_v21 = vor.u32 %v450_v19, %v401_v18  ;;  %v403_v22 = vld [vmem:[#allocation2 + $0xd8] sm:$0xf0]  ;;  %v377_v23 = vld [vmem:[#allocation2 + $0xa0] sm:$0xf] }
   0xb   :  { %v445_v24 = vld [vmem:[#allocation2 + $0xac] sm:$0xf0]  ;;  %v406_v25 = vor.u32 %v448_v20, %v403_v22  ;;  %v443_v26 = vld [vmem:[#allocation2 + $0xa4] sm:$0xf]  ;;  %v379_v27 = vld [vmem:[#allocation2 + $0xb0] sm:$0xf0] }
   0xc   :  { %v385_v28 = vld [vmem:[#allocation2 + $0xa8] sm:$0xf]  ;;  %235 = vmatpush.bf16.msra.mxu0 %v394_v16  ;;  %v378_v29 = vor.u32 %v445_v24, %v377_v23  ;;  %v446_v30 = vld [vmem:[#allocation2 + $0xb4] sm:$0xf0]  ;;  %v444_v31 = vld [vmem:[#allocation2 + $0xac] sm:$0xf]  ;;  %v382_v33 = vor.u32 %v443_v26, %v379_v27 }
   0xd   :  { %v387_v32 = vld [vmem:[#allocation2 + $0xb8] sm:$0xf0]  ;;  %248 = vmatpush.bf16.msra.mxu1 %v398_v17  ;;  %v386_v34 = vor.u32 %v446_v30, %v385_v28  ;;  %v361_v35 = vld [vmem:[#allocation2 + $0x80] sm:$0xf]  ;;  %v441_v36 = vld [vmem:[#allocation2 + $0x8c] sm:$0xf0] }
   0xe   :  { %261 = vmatpush.bf16.msra.mxu2 %v402_v21  ;;  %v439_v37 = vld [vmem:[#allocation2 + $0x84] sm:$0xf]  ;;  %274 = vmatpush.bf16.msra.mxu3 %v406_v25  ;;  %v390_v38 = vor.u32 %v444_v31, %v387_v32  ;;  %v363_v39 = vld [vmem:[#allocation2 + $0x90] sm:$0xf0]  ;;  %v369_v40 = vld [vmem:[#allocation2 + $0x88] sm:$0xf]  ;;  %v362_v44 = vor.u32 %v441_v36, %v361_v35 }
   0xf   :  { %v442_v41 = vld [vmem:[#allocation2 + $0x94] sm:$0xf0]  ;;  %v440_v42 = vld [vmem:[#allocation2 + $0x8c] sm:$0xf]  ;;  %v371_v43 = vld [vmem:[#allocation2 + $0x98] sm:$0xf0]  ;;  %v366_v45 = vor.u32 %v439_v37, %v363_v39 }
  0x10   :  { %236 = vmatpush.bf16.msra.mxu0 %v378_v29  ;;  %v370_v46 = vor.u32 %v442_v41, %v369_v40  ;;  %v345_v47 = vld [vmem:[#allocation2 + $0x60] sm:$0xf]  ;;  %v437_v48 = vld [vmem:[#allocation2 + $0x6c] sm:$0xf0]  ;;  %v435_v49 = vld [vmem:[#allocation2 + $0x64] sm:$0xf]  ;;  %v374_v50 = vor.u32 %v440_v42, %v371_v43 }
  0x11   :  { %249 = vmatpush.bf16.msra.mxu1 %v382_v33  ;;  %v347_v51 = vld [vmem:[#allocation2 + $0x70] sm:$0xf0]  ;;  %v353_v52 = vld [vmem:[#allocation2 + $0x68] sm:$0xf]  ;;  %v438_v53 = vld [vmem:[#allocation2 + $0x74] sm:$0xf0]  ;;  %v346_v56 = vor.u32 %v437_v48, %v345_v47 }
  0x12   :  { %262 = vmatpush.bf16.msra.mxu2 %v386_v34  ;;  %275 = vmatpush.bf16.msra.mxu3 %v390_v38  ;;  %v436_v54 = vld [vmem:[#allocation2 + $0x6c] sm:$0xf]  ;;  %v355_v55 = vld [vmem:[#allocation2 + $0x78] sm:$0xf0]  ;;  %v350_v57 = vor.u32 %v435_v49, %v347_v51  ;;  %v354_v58 = vor.u32 %v438_v53, %v353_v52  ;;  %v329_v59 = vld [vmem:[#allocation2 + $0x40] sm:$0xf] }
  0x13   :  { %v433_v60 = vld [vmem:[#allocation2 + $0x4c] sm:$0xf0]  ;;  %v431_v61 = vld [vmem:[#allocation2 + $0x44] sm:$0xf]  ;;  %v358_v62 = vor.u32 %v436_v54, %v355_v55  ;;  %v331_v63 = vld [vmem:[#allocation2 + $0x50] sm:$0xf0] }
  0x14   :  { %237 = vmatpush.bf16.msra.mxu0 %v362_v44  ;;  %v337_v0 = vld [vmem:[#allocation2 + $0x48] sm:$0xf]  ;;  %v434_v1 = vld [vmem:[#allocation2 + $0x54] sm:$0xf0]  ;;  %v432_v2 = vld [vmem:[#allocation2 + $0x4c] sm:$0xf]  ;;  %v330_v4 = vor.u32 %v433_v60, %v329_v59  ;;  %v334_v5 = vor.u32 %v431_v61, %v331_v63 }
  0x15   :  { %250 = vmatpush.bf16.msra.mxu1 %v366_v45  ;;  %v339_v3 = vld [vmem:[#allocation2 + $0x58] sm:$0xf0]  ;;  %v338_v6 = vor.u32 %v434_v1, %v337_v0  ;;  %v313_v7 = vld [vmem:[#allocation2 + $0x20] sm:$0xf]  ;;  %v429_v8 = vld [vmem:[#allocation2 + $0x2c] sm:$0xf0] }
  0x16   :  { %263 = vmatpush.bf16.msra.mxu2 %v370_v46  ;;  %276 = vmatpush.bf16.msra.mxu3 %v374_v50  ;;  %v427_v9 = vld [vmem:[#allocation2 + $0x24] sm:$0xf]  ;;  %v342_v10 = vor.u32 %v432_v2, %v339_v3  ;;  %v315_v11 = vld [vmem:[#allocation2 + $0x30] sm:$0xf0]  ;;  %v321_v12 = vld [vmem:[#allocation2 + $0x28] sm:$0xf]  ;;  %v314_v16 = vor.u32 %v429_v8, %v313_v7 }
  0x17   :  { %v430_v13 = vld [vmem:[#allocation2 + $0x34] sm:$0xf0]  ;;  %v428_v14 = vld [vmem:[#allocation2 + $0x2c] sm:$0xf]  ;;  %v323_v15 = vld [vmem:[#allocation2 + $0x38] sm:$0xf0]  ;;  %v318_v17 = vor.u32 %v427_v9, %v315_v11 }
  0x18   :  { %238 = vmatpush.bf16.msra.mxu0 %v346_v56  ;;  %v322_v18 = vor.u32 %v430_v13, %v321_v12  ;;  %v297_v19 = vld [vmem:[#allocation2] sm:$0xf]  ;;  %v425_v20 = vld [vmem:[#allocation2 + $0xc] sm:$0xf0]  ;;  %v423_v21 = vld [vmem:[#allocation2 + $0x4] sm:$0xf]  ;;  %v326_v22 = vor.u32 %v428_v14, %v323_v15 }
  0x19   :  { %251 = vmatpush.bf16.msra.mxu1 %v350_v57  ;;  %v299_v23 = vld [vmem:[#allocation2 + $0x10] sm:$0xf0]  ;;  %v305_v24 = vld [vmem:[#allocation2 + $0x8] sm:$0xf]  ;;  %v426_v25 = vld [vmem:[#allocation2 + $0x14] sm:$0xf0]  ;;  %v298_v28 = vor.u32 %v425_v20, %v297_v19 }
  0x1a   :  { %264 = vmatpush.bf16.msra.mxu2 %v354_v58  ;;  %277 = vmatpush.bf16.msra.mxu3 %v358_v62  ;;  %v424_v26 = vld [vmem:[#allocation2 + $0xc] sm:$0xf]  ;;  %v307_v27 = vld [vmem:[#allocation2 + $0x18] sm:$0xf0]  ;;  %v30_v29 = vld [vmem:[%s528_s0] sm:$0xff]  ;;  %v302_v30 = vor.u32 %v423_v21, %v299_v23  ;;  %v306_v31 = vor.u32 %v426_v25, %v305_v24 }
  0x1b   :  { %v310_v32 = vor.u32 %v424_v26, %v307_v27  ;;  %v31_v33 = vpack.c.bf16 %v30_v29, %v30_v29  ;;  %v64_v34 = vld [vmem:[%s530_s2] sm:$0xf] }
  0x1c   :  { %239 = vmatpush.bf16.msra.mxu0 %v330_v4  ;;  %v66_v35 = vperm.slane %v64_v34, 0  ;;  %v67_v36 = vperm.slane %v64_v34, 1  ;;  %v68_v41 = vperm.slane %v64_v34, 2  ;;  %v69_v42 = vperm.slane %v64_v34, 3 }
  0x1d   :  { %252 = vmatpush.bf16.msra.mxu1 %v334_v5 }
  0x1e   :  { %265 = vmatpush.bf16.msra.mxu2 %v338_v6  ;;  %278 = vmatpush.bf16.msra.mxu3 %v342_v10 }
  0x20   :  { %240 = vmatpush.bf16.msra.mxu0 %v314_v16 }
  0x21   :  { %253 = vmatpush.bf16.msra.mxu1 %v318_v17 }
  0x22   :  { %266 = vmatpush.bf16.msra.mxu2 %v322_v18  ;;  %279 = vmatpush.bf16.msra.mxu3 %v326_v22 }
  0x24   :  { %241 = vmatpush.bf16.msra.mxu0 %v298_v28 }
  0x25   :  { %254 = vmatpush.bf16.msra.mxu1 %v302_v30 }
  0x26   :  { %267 = vmatpush.bf16.msra.mxu2 %v306_v31  ;;  %280 = vmatpush.bf16.msra.mxu3 %v310_v32 }
  0x27   :  { %242 = vmatmul.bf16.vlgmr.msra.gmra.mxu0 %v31_v33 }
  0x28   :  { %255 = vmatmul.bf16.vlgmr.msra.gmra.mxu1 %v31_v33 }
  0x29   :  { %268 = vmatmul.bf16.vlgmr.msra.gmra.mxu2 %v31_v33  ;;  %281 = vmatmul.bf16.vlgmr.msra.gmra.mxu3 %v31_v33 }
  0xa4   :  { %v243_v37 = vpop.f32.mrf.mxu0 }
  0xa5   :  { %v244_v38 = vadd.f32 %v243_v37, %v66_v35  ;;  %v256_v39 = vpop.f32.mrf.mxu1 }
  0xa6   :  { %v257_v40 = vadd.f32 %v256_v39, %v67_v36 }
  0xa7   :  { %286 = vst [vmem:[%s531_s3] sm:$0xff] %v244_v38 }
  0xa8   :  { %287 = vst [vmem:[%s531_s3 + $0x8] sm:$0xff] %v257_v40 }
  0xac   :  { %v269_v43 = vpop.f32.mrf.mxu2  ;;  %v282_v45 = vpop.f32.mrf.mxu3 }
  0xad   :  { %v270_v44 = vadd.f32 %v269_v43, %v68_v41  ;;  %v245_v46 = vpop.f32.mrf.mxu0  ;;  %v283_v47 = vadd.f32 %v282_v45, %v69_v42  ;;  %v258_v48 = vpop.f32.mrf.mxu1 }
  0xaf   :  { %288 = vst [vmem:[%s531_s3 + $0x10] sm:$0xff] %v270_v44 }
  0xb0   :  { %289 = vst [vmem:[%s531_s3 + $0x18] sm:$0xff] %v283_v47 }
  0xb4   :  { %v271_v49 = vpop.f32.mrf.mxu2  ;;  %v284_v50 = vpop.f32.mrf.mxu3 }
  0xb5   :  { %294 = vsyncpa [#allocation3], 1 }

// kernel: _lambda_.2
= control target key start
LH: loop header
LB: loop body
LE: loop exit
PB: predicated region body
PF: predicated region fallthrough
CT: control target
= control target key end

     0   :  { %s1892_s0 = inlined_call_operand.vmem [shape: f32[8,32], index: 0, kind: input, shape index: {}]   ;;  %s1893_s1 = inlined_call_operand.vmem [shape: f32[2,8,32], index: 1, kind: input, shape index: {}, may-alias: {1,18}]   ;;  %s1894_s2 = inlined_call_operand.vmem [shape: f32[8,8,32], index: 2, kind: input, shape index: {}]   ;;  %s1895_s3 = inlined_call_operand.hbm [shape: f32[32,32], index: 3, kind: input, shape index: {}]   ;;  %s1896_s4 = inlined_call_operand.hbm [shape: f32[3,32,32], index: 4, kind: input, shape index: {}]   ;;  %s1897_s5 = inlined_call_operand.hbm [shape: f32[3,32,32], index: 5, kind: input, shape index: {}]   ;;  %s1898_s6 = inlined_call_operand.hbm [shape: f32[3,32,32], index: 6, kind: input, shape index: {}]   ;;  %s1899_s7 = inlined_call_operand.hbm [shape: f32[3,1,32], index: 7, kind: input, shape index: {}]   ;;  %s1900_s8 = inlined_call_operand.hbm [shape: f32[3,1,32], index: 8, kind: input, shape index: {}]   ;;  %s1901_s9 = inlined_call_operand.hbm [shape: f32[3,32,32], index: 9, kind: input, shape index: {}]   ;;  %s1902_s10 = inlined_call_operand.vmem [shape: f32[3,32,32], index: 10, kind: input, shape index: {}]   ;;  %s1903_s11 = inlined_call_operand.vmem [shape: f32[3,1,32], index: 11, kind: input, shape index: {}]   ;;  %s1904_s12 = inlined_call_operand.vmem [shape: f32[3,1,32], index: 12, kind: input, shape index: {}]   ;;  %s1905_s13 = inlined_call_operand.vmem [shape: f32[32,64], index: 13, kind: input, shape index: {}]   ;;  %s1906_s14 = inlined_call_operand.vmem [shape: f32[1,64], index: 14, kind: input, shape index: {}]   ;;  %s1907_s15 = inlined_call_operand.hbm [shape: f32[64,128], index: 15, kind: input, shape index: {}]   ;;  %s1908_s16 = inlined_call_operand.vmem [shape: f32[1,128], index: 16, kind: input, shape index: {}]   ;;  %s1909_s17 = inlined_call_operand.vmem [shape: f32[8,128], index: 17, kind: output, shape index: {0}]   ;;  %s1910_s18 = inlined_call_operand.vmem [shape: f32[2,8,32], index: 18, kind: output, shape index: {1}, may-alias: {1,18}]  }
   0x1   :  { %1913 = sst [smem:[#allocation20_spill]] %s1892_s0 }
   0x2   :  { %1914 = sst [smem:[#allocation21_spill]] %s1893_s1 }
   0x3   :  { %1915 = sst [smem:[#allocation22_spill]] %s1894_s2 }
   0x4   :  { %24 = vsyncpa [#allocation3], 0 }
   0x5   :  { %25 = vsyncpa [#allocation5], 0 }
   0x6   :  { %26 = vsyncpa [#allocation8], 0 }
   0x7   :  { %27 = vsyncpa [#allocation11], 0 }
   0x8   :  { %28 = vsyncpa [#allocation14], 0  ;;  %s52_s29 = sshll.u32 %s1896_s4, 4  ;;  %s1477_s30 = smov [#allocation4]   ;;  %s53_s29 = int_to_ptr.hbm [resolvable:$true] %s52_s29 }
   0x9   :  { %s54_s0 = sshll.u32 %s1477_s30, 4  ;;  %s78_s20 = sshll.u32 %s1898_s6, 4  ;;  %s55_s0 = int_to_ptr.vmem [resolvable:$true] %s54_s0  ;;  %s79_s20 = int_to_ptr.hbm [resolvable:$true] %s78_s20 }
   0xa   :  { %s1478_s21 = smov 128   ;;  %s1479_s22 = smov 8  }
   0xb   :  { %60 = dma.hbm_to_vmem [thread:$0]  %s53_s29, 1536, %s55_s0, [#allocation5], %s1478_s21, %s1478_s21, %s1479_s22  }
   0xc   :  { %s1480_s2 = smov [#allocation7]   ;;  %s104_s25 = sshll.u32 %s1900_s8, 4  ;;  %s105_s25 = int_to_ptr.hbm [resolvable:$true] %s104_s25 }
   0xd   :  { %s80_s23 = sshll.u32 %s1480_s2, 4  ;;  %s1481_s6 = smov [#allocation10]   ;;  %s81_s23 = int_to_ptr.vmem [resolvable:$true] %s80_s23 }
   0xe   :  { %86 = dma.hbm_to_vmem [thread:$0]  %s79_s20, 1536, %s81_s23, [#allocation8], %s1478_s21, %s1478_s21, %s1479_s22  }
   0xf   :  { %s106_s26 = sshll.u32 %s1481_s6, 4  ;;  %s39_s29 = sshll.u32 %s1895_s3, 4  ;;  %s107_s26 = int_to_ptr.vmem [resolvable:$true] %s106_s26  ;;  %s40_s29 = int_to_ptr.hbm [resolvable:$true] %s39_s29 }
  0x10   :  { %s1482_s30 = smov 16   ;;  %s1483_s0 = smov 1  }
  0x11   :  { %112 = dma.hbm_to_vmem [thread:$0]  %s105_s25, 48, %s107_s26, [#allocation11], %s1482_s30, %s1482_s30, %s1483_s0  }
  0x12   :  { %s1484_s19 = smov [#allocation2]   ;;  %s65_s23 = sshll.u32 %s1897_s5, 4  ;;  %s66_s23 = int_to_ptr.hbm [resolvable:$true] %s65_s23 }
  0x13   :  { %s41_s1 = sshll.u32 %s1484_s19, 4  ;;  %s91_s3 = sshll.u32 %s1899_s7, 4  ;;  %s42_s1 = int_to_ptr.vmem [resolvable:$true] %s41_s1  ;;  %s92_s3 = int_to_ptr.hbm [resolvable:$true] %s91_s3 }
  0x14   :  { %47 = dma.hbm_to_vmem [thread:$0]  %s40_s29, 512, %s42_s1, [#allocation3], %s1478_s21, %s1478_s21, %s1479_s22  }
  0x15   :  { %s1485_s24 = smov [#allocation6]   ;;  %s1486_s25 = smov [#allocation9]  }
  0x16   :  { %s67_s6 = sshll.u32 %s1485_s24, 4  ;;  %s93_s5 = sshll.u32 %s1486_s25, 4  ;;  %s68_s6 = int_to_ptr.vmem [resolvable:$true] %s67_s6  ;;  %s94_s5 = int_to_ptr.vmem [resolvable:$true] %s93_s5 }
  0x17   :  { %73 = dma.hbm_to_vmem [thread:$0]  %s66_s23, 1536, %s68_s6, [#allocation5], %s1478_s21, %s1478_s21, %s1479_s22  }
  0x18   :  { %s117_s28 = sshll.u32 %s1901_s9, 4  ;;  %s140_s7 = sshll.u32 %s1907_s15, 4  ;;  %s118_s28 = int_to_ptr.hbm [resolvable:$true] %s117_s28  ;;  %s141_s7 = int_to_ptr.hbm [resolvable:$true] %s140_s7 }
  0x19   :  { %99 = dma.hbm_to_vmem [thread:$0]  %s92_s3, 48, %s94_s5, [#allocation8], %s1482_s30, %s1482_s30, %s1483_s0  }
  0x1a   :  { %s1487_s1 = smov [#allocation12]   ;;  %s1488_s20 = smov [#allocation13]  }
  0x1b   :  { %s119_s2 = sshll.u32 %s1487_s1, 4  ;;  %s142_s23 = sshll.u32 %s1488_s20, 4  ;;  %s120_s2 = int_to_ptr.vmem [resolvable:$true] %s119_s2  ;;  %s143_s23 = int_to_ptr.vmem [resolvable:$true] %s142_s23 }
  0x1c   :  { %125 = dma.hbm_to_vmem [thread:$0]  %s118_s28, 1536, %s120_s2, [#allocation11], %s1478_s21, %s1478_s21, %s1479_s22  }
  0x1d   :  { %148 = dma.hbm_to_vmem [thread:$0]  %s141_s7, 1024, %s143_s23, [#allocation14], %s1478_s21, %s1478_s21, %s1479_s22  }
  0x1e   :  { %1467 = dma.done.wait [#allocation3], 512  }
  0x1f   :  { %1468 = vsyncadd [#allocation3], 4294966784 }
  0x20   :  { %1469 = dma.done.wait [#allocation5], 3072  }
  0x21   :  { %1470 = vsyncadd [#allocation5], 4294964224 }
  0x22   :  { %1471 = dma.done.wait [#allocation8], 1584  }
  0x23   :  { %1472 = vsyncadd [#allocation8], 4294965712 }
  0x24   :  { %1473 = dma.done.wait [#allocation11], 1584  }
  0x25   :  { %1474 = vsyncadd [#allocation11], 4294965712 }
  0x26   :  { %1475 = dma.done.wait [#allocation14], 1024  }
  0x27   :  { %1476 = vsyncadd [#allocation14], 4294966272  ;;  %v196_v0 = vld [vmem:[#allocation2 + $0x18] sm:$0xff]  ;;  %v195_v1 = vld [vmem:[#allocation2 + $0x10] sm:$0xff]  ;;  %vm197_vm0 = vcmask 261120   ;;  %s1916_s21 = sld [smem:[#allocation21_spill]]  ;;  %v285_v46 = vlaneseq }
  0x28   :  { %213 = vmatpush.msra.mxu0 %v196_v0  ;;  %v194_v2 = vld [vmem:[#allocation2 + $0x8] sm:$0xff]  ;;  %v193_v3 = vld [vmem:[#allocation2] sm:$0xff]  ;;  %s1917_s0 = sld [smem:[#allocation22_spill]]  ;;  %vm295_vm1 = vcmask 1041409   ;;  %vm297_vm2 = vcmask 1042434   ;;  %vm299_vm3 = vcmask 1043459  }
  0x29   :  { %v1690_v49 = vand.u32 127, %v285_v46  ;;  %vm301_vm4 = vcmask 1044484   ;;  %vm303_vm5 = vcmask 1045509   ;;  %vm305_vm6 = vcmask 1046534   ;;  %s1918_s23 = sld [smem:[#allocation20_spill]] }
  0x2a   :  { %214 = vmatpush.msra.mxu0 %v195_v1  ;;  %vm307_vm7 = vcmask 1047559   ;;  %vm310_vm8 = vcmask 64512  }
  0x2c   :  { %215 = vmatpush.msra.mxu0 %v194_v2 }
  0x2d   :  { %v1630_v4 = vld [vmem:[%s1916_s21] sm:$0xff] }
  0x2e   :  { %216 = vmatpush.msra.mxu0 %v193_v3  ;;  %v1637_v6 = vld [vmem:[%s1917_s0] sm:$0xff]  ;;  %v1647_v12 = vld [vmem:[%s1917_s0 + $0x10] sm:$0xff]  ;;  %v1656_v22 = vld [vmem:[%s1917_s0 + $0x8] sm:$0xff] }
  0x2f   :  { %1171 = vmatmul.msk.f32.vlgmr.msra.gmra.mxu0 %vm197_vm0, %v1630_v4  ;;  %v1642_v11 = vld [vmem:[%s1917_s0 + $0x20] sm:$0xff]  ;;  %v1663_v27 = vld [vmem:[%s1917_s0 + $0x28] sm:$0xff]  ;;  %v1668_v28 = vld [vmem:[%s1917_s0 + $0x18] sm:$0xff] }
  0x30   :  { %v1677_v36 = vld [vmem:[%s1917_s0 + $0x30] sm:$0xff]  ;;  %v1684_v40 = vld [vmem:[%s1917_s0 + $0x38] sm:$0xff] }
  0xac   :  { %v218_v5 = vpop.f32.mrf.mxu0 }
  0xad   :  { %v229_v7 = vperm.slane %v218_v5, 0  ;;  %v225_v8 = vrot.slane %v218_v5, 4  ;;  %v223_v9 = vrot.slane %v218_v5, 2  ;;  %v222_v10 = vrot.slane %v218_v5, 1 }
  0xae   :  { %v226_v13 = vrot.slane %v218_v5, 5  ;;  %v224_v17 = vrot.slane %v218_v5, 3  ;;  %v227_v30 = vrot.slane %v218_v5, 6  ;;  %v228_v33 = vrot.slane %v218_v5, 7 }
  0xaf   :  { %v245_v14 = vmul.f32 %v229_v7, %v1637_v6  ;;  %v233_v15 = vperm.slane %v225_v8, 0  ;;  %v231_v16 = vperm.slane %v223_v9, 0  ;;  %v230_v21 = vperm.slane %v222_v10, 0 }
  0xb0   :  { %v234_v25 = vperm.slane %v226_v13, 0  ;;  %v232_v26 = vperm.slane %v224_v17, 0  ;;  %v235_v35 = vperm.slane %v227_v30, 0  ;;  %v236_v39 = vperm.slane %v228_v33, 0 }
  0xb1   :  { %v253_v18 = vsel %vm197_vm0, %v245_v14, 0.0  ;;  %v249_v19 = vmul.f32 %v233_v15, %v1642_v11  ;;  %v247_v20 = vmul.f32 %v231_v16, %v1647_v12  ;;  %v246_v29 = vmul.f32 %v230_v21, %v1656_v22 }
  0xb2   :  { %254 = vadd.xlane.f32.xlu0 %v253_v18  ;;  %v250_v31 = vmul.f32 %v234_v25, %v1663_v27  ;;  %v248_v32 = vmul.f32 %v232_v26, %v1668_v28  ;;  %v251_v41 = vmul.f32 %v235_v35, %v1677_v36  ;;  %v252_v42 = vmul.f32 %v236_v39, %v1684_v40 }
  0xb3   :  { %v265_v23 = vsel %vm197_vm0, %v249_v19, 0.0  ;;  %v259_v24 = vsel %vm197_vm0, %v247_v20, 0.0  ;;  %v256_v34 = vsel %vm197_vm0, %v246_v29, 0.0  ;;  %v1489_v9 = vmov 0  }
  0xb4   :  { %266 = vadd.xlane.f32.xlu2 %v265_v23  ;;  %260 = vadd.xlane.f32.xlu1 %v259_v24  ;;  %v268_v37 = vsel %vm197_vm0, %v250_v31, 0.0  ;;  %v262_v38 = vsel %vm197_vm0, %v248_v32, 0.0  ;;  %v271_v43 = vsel %vm197_vm0, %v251_v41, 0.0  ;;  %v274_v44 = vsel %vm197_vm0, %v252_v42, 0.0 }
  0xb5   :  { %1222 = vset.pattern.permute.xlu2 %v1489_v9  ;;  %1221 = vset.pattern.permute.xlu1 %v1489_v9 }
  0xb6   :  { %1220 = vset.pattern.permute.xlu0 %v1489_v9 }
  0xba   :  { %257 = vadd.xlane.f32.xlu0 %v256_v34 }
  0xbc   :  { %269 = vadd.xlane.f32.xlu2 %v268_v37  ;;  %263 = vadd.xlane.f32.xlu1 %v262_v38 }
  0xc2   :  { %272 = vadd.xlane.f32.xlu0 %v271_v43 }
  0xc4   :  { %275 = vadd.xlane.f32.xlu1 %v274_v44 }
 0x125   :  { %v255_v45 = vpop.xlane.xlu0 %254 }
 0x126   :  { %v287_v51 = vperm.slane %v255_v45, %v1690_v49 }
 0x127   :  { %v261_v47 = vpop.xlane.xlu1 %260  ;;  %v267_v48 = vpop.xlane.xlu2 %266 }
 0x128   :  { %v289_v53 = vperm.slane %v261_v47, %v1690_v49  ;;  %v291_v58 = vperm.slane %v267_v48, %v1690_v49 }
 0x12d   :  { %v258_v50 = vpop.xlane.xlu0 %257 }
 0x12e   :  { %v288_v52 = vperm.slane %v258_v50, %v1690_v49 }
 0x12f   :  { %v264_v54 = vpop.xlane.xlu1 %263  ;;  %v270_v59 = vpop.xlane.xlu2 %269 }
 0x130   :  { %v296_v55 = vsel %vm295_vm1, %v288_v52, %v287_v51  ;;  %v290_v56 = vperm.slane %v264_v54, %v1690_v49  ;;  %v292_v62 = vperm.slane %v270_v59, %v1690_v49 }
 0x131   :  { %v298_v57 = vsel %vm297_vm2, %v289_v53, %v296_v55 }
 0x132   :  { %v300_v60 = vsel %vm299_vm3, %v290_v56, %v298_v57 }
 0x133   :  { %v302_v61 = vsel %vm301_vm4, %v291_v58, %v300_v60 }
 0x134   :  { %v304_v2 = vsel %vm303_vm5, %v292_v62, %v302_v61 }
 0x135   :  { %v273_v63 = vpop.xlane.xlu0 %272 }
 0x136   :  { %v293_v0 = vperm.slane %v273_v63, %v1690_v49 }
 0x137   :  { %v276_v1 = vpop.xlane.xlu1 %275 }
 0x138   :  { %v294_v3 = vperm.slane %v276_v1, %v1690_v49  ;;  %v306_v5 = vsel %vm305_vm6, %v293_v0, %v304_v2 }
 0x13a   :  { %v308_v7 = vsel %vm307_vm7, %v294_v3, %v306_v5 }
 0x13b   :  { %v311_v8 = vsel %vm310_vm8, %v308_v7, -inf }
 0x13c   :  { %312 = vmax.xlane.f32.xlu2 %v311_v8 }
 0x1af   :  { %v313_v10 = vpop.xlane.xlu2 %312 }
 0x1b0   :  { %v317_v13 = vperm.slane %v313_v10, 2  ;;  %v316_v14 = vperm.slane %v313_v10, 1  ;;  %v315_v15 = vperm.slane %v313_v10, 0  ;;  %v318_v19 = vperm.slane %v313_v10, 3 }
 0x1b1   :  { %v319_v20 = vperm.slane %v313_v10, 4  ;;  %v322_v21 = vperm.slane %v313_v10, 7  ;;  %v320_v32 = vperm.slane %v313_v10, 5  ;;  %v321_v34 = vperm.slane %v313_v10, 6 }
 0x1b2   :  { %v333_v16 = vsub.f32 %v261_v47, %v317_v13  ;;  %v332_v17 = vsub.f32 %v258_v50, %v316_v14  ;;  %v331_v18 = vsub.f32 %v255_v45, %v315_v15  ;;  %v334_v26 = vsub.f32 %v264_v54, %v318_v19 }
 0x1b3   :  { %v335_v29 = vsub.f32 %v267_v48, %v319_v20  ;;  %v338_v30 = vsub.f32 %v276_v1, %v322_v21  ;;  %v336_v41 = vsub.f32 %v270_v59, %v320_v32  ;;  %v337_v42 = vsub.f32 %v273_v63, %v321_v34 }
 0x1b4   :  { %v343_v23 = vmul.f32 1.442695, %v333_v16  ;;  %v341_v24 = vmul.f32 1.442695, %v332_v17  ;;  %v339_v25 = vmul.f32 1.442695, %v331_v18 }
 0x1b5   :  { %v345_v31 = vmul.f32 1.442695, %v334_v26  ;;  %v347_v33 = vmul.f32 1.442695, %v335_v29  ;;  %v353_v37 = vmul.f32 1.442695, %v338_v30 }
 0x1b6   :  { %1237 = vpow2.f32 %v343_v23  ;;  %v349_v43 = vmul.f32 1.442695, %v336_v41  ;;  %v351_v44 = vmul.f32 1.442695, %v337_v42 }
 0x1b7   :  { %1239 = vpow2.f32 %v341_v24 }
 0x1b8   :  { %1241 = vpow2.f32 %v339_v25 }
 0x1b9   :  { %1243 = vpow2.f32 %v345_v31 }
 0x1ba   :  { %1245 = vpow2.f32 %v347_v33 }
 0x1bb   :  { %1247 = vpow2.f32 %v353_v37 }
 0x1bc   :  { %v1708_v35 = vpop.eup %1237  ;;  %1249 = vpow2.f32 %v349_v43 }
 0x1bd   :  { %v1240_v38 = vpop.eup %1239  ;;  %370 = vperm.xlu2 %1222, %v1708_v35   ;;  %1251 = vpow2.f32 %v351_v44 }
 0x1be   :  { %v1242_v39 = vpop.eup %1241  ;;  %367 = vperm.xlu1 %1221, %v1240_v38  }
 0x1bf   :  { %364 = vperm.xlu0 %1220, %v1242_v39   ;;  %v1244_v45 = vpop.eup %1243 }
 0x1c0   :  { %v1246_v46 = vpop.eup %1245 }
 0x1c1   :  { %v1248_v47 = vpop.eup %1247 }
 0x1c2   :  { %v1250_v48 = vpop.eup %1249 }
 0x1c3   :  { %v1252_v50 = vpop.eup %1251 }
 0x1c5   :  { %373 = vperm.xlu2 %1222, %v1244_v45  }
 0x1c6   :  { %376 = vperm.xlu1 %1221, %v1246_v46  }
 0x1c7   :  { %385 = vperm.xlu0 %1220, %v1248_v47  }
 0x1cd   :  { %379 = vperm.xlu2 %1222, %v1250_v48  }
 0x1ce   :  { %382 = vperm.xlu1 %1221, %v1252_v50  }
 0x217   :  { %v371_v51 = vpop.permute.xlu2 %370 }
 0x218   :  { %v389_v59 = vperm.slane %v371_v51, %v1690_v49  ;;  %v617_v51 = vld [vmem:[#allocation6 + $0x30] sm:$0xff] }
 0x21f   :  { %v374_v54 = vpop.permute.xlu2 %373 }
 0x220   :  { %v390_v62 = vperm.slane %v374_v54, %v1690_v49  ;;  %v541_v54 = vld [vmem:[#allocation6 + $0x8] sm:$0xff] }
 0x227   :  { %v380_v63 = vpop.permute.xlu2 %379 }
 0x228   :  { %v392_v3 = vperm.slane %v380_v63, %v1690_v49  ;;  %v615_v63 = vld [vmem:[#allocation6 + $0x20] sm:$0xff] }
 0x230   :  { %v368_v52 = vpop.permute.xlu1 %367 }
 0x231   :  { %v365_v53 = vpop.permute.xlu0 %364  ;;  %v388_v55 = vperm.slane %v368_v52, %v1690_v49 }
 0x232   :  { %v387_v56 = vperm.slane %v365_v53, %v1690_v49 }
 0x234   :  { %v395_v57 = vsel %vm295_vm1, %v388_v55, %v387_v56 }
 0x235   :  { %v396_v60 = vsel %vm297_vm2, %v389_v59, %v395_v57  ;;  %v616_v57 = vld [vmem:[#allocation6 + $0x28] sm:$0xff] }
 0x236   :  { %v397_v0 = vsel %vm299_vm3, %v390_v62, %v396_v60  ;;  %v672_v59 = vld [vmem:[#allocation6 + $0x48] sm:$0xff]  ;;  %v540_v62 = vld [vmem:[#allocation6] sm:$0xff] }
 0x238   :  { %v377_v58 = vpop.permute.xlu1 %376 }
 0x239   :  { %v391_v61 = vperm.slane %v377_v58, %v1690_v49  ;;  %v386_v2 = vpop.permute.xlu0 %385  ;;  %v611_v58 = vld [vmem:[#allocation4 + $0x28] sm:$0xff] }
 0x23a   :  { %v394_v8 = vperm.slane %v386_v2, %v1690_v49 }
 0x23b   :  { %v398_v1 = vsel %vm301_vm4, %v391_v61, %v397_v0 }
 0x23c   :  { %v399_v9 = vsel %vm303_vm5, %v392_v3, %v398_v1  ;;  %v671_v3 = vld [vmem:[#allocation6 + $0x40] sm:$0xff] }
 0x240   :  { %v383_v5 = vpop.permute.xlu1 %382 }
 0x241   :  { %v393_v7 = vperm.slane %v383_v5, %v1690_v49  ;;  %v539_v5 = vld [vmem:[#allocation4 + $0x18] sm:$0xff] }
 0x243   :  { %v400_v10 = vsel %vm305_vm6, %v393_v7, %v399_v9  ;;  %v1739_v7 = vld [vmem:[%s1918_s23] sm:$0xff] }
 0x244   :  { %v401_v13 = vsel %vm307_vm7, %v394_v8, %v400_v10  ;;  %v724_v8 = vld [vmem:[#allocation7 + $0x18] sm:$0xff] }
 0x245   :  { %v403_v14 = vsel %vm310_vm8, %v401_v13, 0.0 }
 0x246   :  { %404 = vadd.xlane.f32.xlu2 %v403_v14  ;;  %v753_v14 = vld [vmem:[#allocation7 + $0x38] sm:$0xff] }
 0x2b9   :  { %v405_v15 = vpop.xlane.xlu2 %404 }
 0x2ba   :  { %1253 = vrcp.f32 %v405_v15  ;;  %v538_v15 = vld [vmem:[#allocation4 + $0x10] sm:$0xff] }
 0x2c0   :  { %v1254_v16 = vpop.eup %1253 }
 0x2c1   :  { %v409_v17 = vperm.slane %v1254_v16, 1  ;;  %v408_v18 = vperm.slane %v1254_v16, 0  ;;  %v411_v21 = vperm.slane %v1254_v16, 3  ;;  %v410_v49 = vperm.slane %v1254_v16, 2 }
 0x2c2   :  { %v413_v25 = vperm.slane %v1254_v16, 5  ;;  %v412_v26 = vperm.slane %v1254_v16, 4  ;;  %v415_v31 = vperm.slane %v1254_v16, 7  ;;  %v414_v32 = vperm.slane %v1254_v16, 6 }
 0x2c3   :  { %v425_v19 = vmul.f32 %v1240_v38, %v409_v17  ;;  %v424_v20 = vmul.f32 %v1242_v39, %v408_v18  ;;  %v427_v23 = vmul.f32 %v1244_v45, %v411_v21  ;;  %v426_v24 = vmul.f32 %v1708_v35, %v410_v49  ;;  %v543_v45 = vld [vmem:[#allocation6 + $0x18] sm:$0xff]  ;;  %v723_v17 = vld [vmem:[#allocation7 + $0x10] sm:$0xff]  ;;  %v537_v49 = vld [vmem:[#allocation4 + $0x8] sm:$0xff] }
 0x2c4   :  { %v429_v29 = vmul.f32 %v1250_v48, %v413_v25  ;;  %v428_v30 = vmul.f32 %v1246_v46, %v412_v26  ;;  %v431_v33 = vmul.f32 %v1248_v47, %v415_v31  ;;  %v430_v34 = vmul.f32 %v1252_v50, %v414_v32  ;;  %v618_v46 = vld [vmem:[#allocation6 + $0x38] sm:$0xff]  ;;  %573 = vmatpush.msra.mxu2 %v543_v45  ;;  %v542_v50 = vld [vmem:[#allocation6 + $0x10] sm:$0xff]  ;;  %v722_v25 = vld [vmem:[#allocation7 + $0x8] sm:$0xff] }
 0x2c5   :  { %439 = vperm.xlu0 %1220, %v425_v19   ;;  %434 = vperm.xlu1 %1221, %v424_v20   ;;  %v613_v48 = vld [vmem:[#allocation4 + $0x38] sm:$0xff]  ;;  %v752_v21 = vld [vmem:[#allocation7 + $0x30] sm:$0xff]  ;;  %v536_v31 = vld [vmem:[#allocation4] sm:$0xff] }
 0x2c6   :  { %631 = vmatpush.msra.mxu3 %v618_v46  ;;  %v674_v47 = vld [vmem:[#allocation6 + $0x58] sm:$0xff]  ;;  %651 = vmatpush.msrb.mxu0 %v613_v48 }
 0x2c7   :  { %687 = vmatpush.msra.mxu1 %v674_v47  ;;  %574 = vmatpush.msra.mxu2 %v542_v50 }
 0x2c8   :  { %632 = vmatpush.msra.mxu3 %v617_v51 }
 0x2c9   :  { %575 = vmatpush.msra.mxu2 %v541_v54  ;;  %v783_v54 = vld [vmem:[#allocation7 + $0x58] sm:$0xff] }
 0x2ca   :  { %633 = vmatpush.msra.mxu3 %v616_v57 }
 0x2cb   :  { %576 = vmatpush.msra.mxu2 %v540_v62 }
 0x2cc   :  { %634 = vmatpush.msra.mxu3 %v615_v63 }
 0x2cd   :  { %449 = vperm.xlu0 %1220, %v427_v23   ;;  %444 = vperm.xlu1 %1221, %v426_v24  }
 0x2ce   :  { %596 = vmatpush.msrb.mxu2 %v539_v5  ;;  %741 = vmatpush.msrb.mxu3 %v724_v8 }
 0x2d0   :  { %597 = vmatpush.msrb.mxu2 %v538_v15  ;;  %742 = vmatpush.msrb.mxu3 %v723_v17 }
 0x2d2   :  { %598 = vmatpush.msrb.mxu2 %v537_v49  ;;  %743 = vmatpush.msrb.mxu3 %v722_v25  ;;  %v668_v25 = vld [vmem:[#allocation4 + $0x50] sm:$0xff] }
 0x2d4   :  { %599 = vmatpush.msrb.mxu2 %v536_v31  ;;  %v1224_v31 = vld [vmem:[#allocation10 + $0x1] ss:$0 sm:$0xff] }
 0x2d5   :  { %459 = vperm.xlu0 %1220, %v429_v29   ;;  %454 = vperm.xlu1 %1221, %v428_v30   ;;  %v751_v30 = vld [vmem:[#allocation7 + $0x28] sm:$0xff] }
 0x2dd   :  { %469 = vperm.xlu0 %1220, %v431_v33   ;;  %464 = vperm.xlu1 %1221, %v430_v34  }
 0x337   :  { %v440_v37 = vpop.permute.xlu0 %439  ;;  %v435_v38 = vpop.permute.xlu1 %434 }
 0x338   :  { %v473_v39 = vmul.f32 %v440_v37, %v1656_v22  ;;  %v472_v35 = vmul.f32 %v435_v38, %v1637_v6  ;;  %v612_v22 = vld [vmem:[#allocation4 + $0x30] sm:$0xff]  ;;  %v721_v37 = vld [vmem:[#allocation7] sm:$0xff] }
 0x339   :  { %v673_v6 = vld [vmem:[#allocation6 + $0x50] sm:$0xff]  ;;  %652 = vmatpush.msrb.mxu0 %v612_v22  ;;  %744 = vmatpush.msrb.mxu3 %v721_v37 }
 0x33a   :  { %v487_v41 = vsel %vm197_vm0, %v473_v39, 0.0  ;;  %v480_v42 = vsel %vm197_vm0, %v472_v35, 0.0  ;;  %688 = vmatpush.msra.mxu1 %v673_v6 }
 0x33b   :  { %v488_v43 = vrot.slane %v487_v41, 4  ;;  %v481_v44 = vrot.slane %v480_v42, 4  ;;  %653 = vmatpush.msrb.mxu0 %v611_v58 }
 0x33c   :  { %689 = vmatpush.msra.mxu1 %v672_v59 }
 0x33d   :  { %v489_v60 = vadd.f32 %v488_v43, %v487_v41  ;;  %v482_v61 = vadd.f32 %v481_v44, %v480_v42 }
 0x33e   :  { %690 = vmatpush.msra.mxu1 %v671_v3 }
 0x33f   :  { %v450_v52 = vpop.permute.xlu0 %449  ;;  %v445_v53 = vpop.permute.xlu1 %444  ;;  %v490_v9 = vrot.slane %v489_v60, 2  ;;  %v483_v10 = vrot.slane %v482_v61, 2 }
 0x340   :  { %v475_v55 = vmul.f32 %v450_v52, %v1668_v28  ;;  %v474_v56 = vmul.f32 %v445_v53, %v1647_v12  ;;  %v610_v28 = vld [vmem:[#allocation4 + $0x20] sm:$0xff]  ;;  %801 = vmatpush.msrb.mxu1 %v783_v54  ;;  %v861_v54 = vld [vmem:[#allocation12 + $0x10] sm:$0xff] }
 0x341   :  { %654 = vmatpush.msrb.mxu0 %v610_v28  ;;  %v491_v26 = vadd.f32 %v490_v9, %v489_v60  ;;  %v484_v29 = vadd.f32 %v483_v10, %v482_v61 }
 0x342   :  { %v501_v0 = vsel %vm197_vm0, %v475_v55, 0.0  ;;  %v494_v1 = vsel %vm197_vm0, %v474_v56, 0.0  ;;  %1175 = vmatmul.msk.f32.vlgmr.msrb.gmra.mxu0 %vm197_vm0, %v1739_v7  ;;  %v782_v55 = vld [vmem:[#allocation7 + $0x50] sm:$0xff] }
 0x343   :  { %v502_v2 = vrot.slane %v501_v0, 4  ;;  %v495_v12 = vrot.slane %v494_v1, 4  ;;  %771 = vmatpush.msra.mxu0 %v753_v14  ;;  %v492_v35 = vrot.slane %v491_v26, 1  ;;  %v485_v41 = vrot.slane %v484_v29, 1  ;;  %802 = vmatpush.msrb.mxu1 %v782_v55  ;;  %v893_v55 = vld [vmem:[#allocation12 + $0x30] sm:$0xff] }
 0x345   :  { %v496_v13 = vadd.f32 %v495_v12, %v494_v1  ;;  %v503_v16 = vadd.f32 %v502_v2, %v501_v0  ;;  %772 = vmatpush.msra.mxu0 %v752_v21  ;;  %v493_v53 = vadd.f32 %v492_v35, %v491_v26  ;;  %v486_v22 = vadd.f32 %v485_v41, %v484_v29  ;;  %v781_v0 = vld [vmem:[#allocation7 + $0x48] sm:$0xff]  ;;  %v780_v1 = vld [vmem:[#allocation7 + $0x40] sm:$0xff] }
 0x346   :  { %803 = vmatpush.msrb.mxu1 %v781_v0  ;;  %v667_v26 = vld [vmem:[#allocation4 + $0x48] sm:$0xff]  ;;  %v666_v29 = vld [vmem:[#allocation4 + $0x40] sm:$0xff] }
 0x347   :  { %v497_v18 = vrot.slane %v496_v13, 2  ;;  %v460_v19 = vpop.permute.xlu0 %459  ;;  %v455_v20 = vpop.permute.xlu1 %454  ;;  %v504_v32 = vrot.slane %v503_v16, 2  ;;  %773 = vmatpush.msra.mxu0 %v751_v30  ;;  %v552_v28 = vsel %vm295_vm1, %v493_v53, %v486_v22  ;;  %v1226_v35 = vld [vmem:[#allocation10] ss:$0 sm:$0xff] }
 0x348   :  { %v477_v23 = vmul.f32 %v460_v19, %v1663_v27  ;;  %v476_v24 = vmul.f32 %v455_v20, %v1642_v11  ;;  %v750_v11 = vld [vmem:[#allocation7 + $0x20] sm:$0xff]  ;;  %804 = vmatpush.msrb.mxu1 %v780_v1  ;;  %v1193_v1 = vld [vmem:[%s1902_s10 + $0x38] sm:$0xff] }
 0x349   :  { %v498_v38 = vadd.f32 %v497_v18, %v496_v13  ;;  %v505_v44 = vadd.f32 %v504_v32, %v503_v16  ;;  %774 = vmatpush.msra.mxu0 %v750_v11  ;;  %v894_v53 = vld [vmem:[#allocation12 + $0x38] sm:$0xff] }
 0x34a   :  { %v515_v33 = vsel %vm197_vm0, %v477_v23, 0.0  ;;  %v508_v34 = vsel %vm197_vm0, %v476_v24, 0.0  ;;  %1179 = vmatmul.msk.f32.vlgmr.msra.gmra.mxu0 %vm197_vm0, %v1630_v4  ;;  %v669_v23 = vld [vmem:[#allocation4 + $0x58] sm:$0xff]  ;;  %v924_v22 = vld [vmem:[#allocation12 + $0x58] sm:$0xff] }
 0x34b   :  { %v516_v27 = vrot.slane %v515_v33, 4  ;;  %v509_v39 = vrot.slane %v508_v34, 4  ;;  %v499_v45 = vrot.slane %v498_v38, 1  ;;  %v506_v56 = vrot.slane %v505_v44, 1  ;;  %942 = vmatpush.msrb.mxu0 %v924_v22 }
 0x34d   :  { %v517_v42 = vadd.f32 %v516_v27, %v515_v33  ;;  %v510_v43 = vadd.f32 %v509_v39, %v508_v34  ;;  %v500_v60 = vadd.f32 %v499_v45, %v498_v38  ;;  %v507_v2 = vadd.f32 %v506_v56, %v505_v44  ;;  %v1223_v33 = vld [vmem:[#allocation9 + $0x1] ss:$0 sm:$0xff]  ;;  %v923_v56 = vld [vmem:[#allocation12 + $0x50] sm:$0xff] }
 0x34e   :  { %943 = vmatpush.msrb.mxu0 %v923_v56 }
 0x34f   :  { %v518_v46 = vrot.slane %v517_v42, 2  ;;  %v511_v48 = vrot.slane %v510_v43, 2  ;;  %v470_v47 = vpop.permute.xlu0 %469  ;;  %v465_v50 = vpop.permute.xlu1 %464  ;;  %v553_v3 = vsel %vm297_vm2, %v500_v60, %v552_v28  ;;  %v922_v60 = vld [vmem:[#allocation12 + $0x48] sm:$0xff] }
 0x350   :  { %v479_v51 = vmul.f32 %v470_v47, %v1684_v40  ;;  %v478_v52 = vmul.f32 %v465_v50, %v1677_v36  ;;  %v554_v15 = vsel %vm299_vm3, %v507_v2, %v553_v3  ;;  %944 = vmatpush.msrb.mxu0 %v922_v60  ;;  %v951_v2 = vld [vmem:[%s1902_s10 + $0x8] sm:$0xff] }
 0x351   :  { %v512_v6 = vadd.f32 %v511_v48, %v510_v43  ;;  %v519_v57 = vadd.f32 %v518_v46, %v517_v42  ;;  %v1225_v42 = vld [vmem:[#allocation9] ss:$0 sm:$0xff] }
 0x352   :  { %v529_v58 = vsel %vm197_vm0, %v479_v51, 0.0  ;;  %v522_v59 = vsel %vm197_vm0, %v478_v52, 0.0  ;;  %v862_v52 = vld [vmem:[#allocation12 + $0x18] sm:$0xff] }
 0x353   :  { %v513_v61 = vrot.slane %v512_v6, 1  ;;  %v530_v62 = vrot.slane %v529_v58, 4  ;;  %v523_v63 = vrot.slane %v522_v59, 4  ;;  %v520_v12 = vrot.slane %v519_v57, 1 }
 0x355   :  { %v531_v40 = vadd.f32 %v530_v62, %v529_v58  ;;  %v524_v36 = vadd.f32 %v523_v63, %v522_v59  ;;  %v514_v5 = vadd.f32 %v513_v61, %v512_v6  ;;  %v521_v14 = vadd.f32 %v520_v12, %v519_v57  ;;  %v860_v58 = vld [vmem:[#allocation12 + $0x8] sm:$0xff]  ;;  %v953_v61 = vld [vmem:[%s1902_s10 + $0x18] sm:$0xff]  ;;  %v859_v62 = vld [vmem:[#allocation12] sm:$0xff] }
 0x356   :  { %v892_v59 = vld [vmem:[#allocation12 + $0x28] sm:$0xff]  ;;  %v891_v63 = vld [vmem:[#allocation12 + $0x20] sm:$0xff] }
 0x357   :  { %v532_v8 = vrot.slane %v531_v40, 2  ;;  %v525_v9 = vrot.slane %v524_v36, 2  ;;  %v555_v18 = vsel %vm301_vm4, %v514_v5, %v554_v15  ;;  %v1192_v12 = vld [vmem:[%s1902_s10 + $0x30] sm:$0xff]  ;;  %v950_v5 = vld [vmem:[%s1902_s10] sm:$0xff] }
 0x358   :  { %v556_v21 = vsel %vm303_vm5, %v521_v14, %v555_v18  ;;  %v1190_v14 = vld [vmem:[%s1902_s10 + $0x20] sm:$0xff] }
 0x359   :  { %v533_v10 = vadd.f32 %v532_v8, %v531_v40  ;;  %v526_v13 = vadd.f32 %v525_v9, %v524_v36  ;;  %v921_v40 = vld [vmem:[#allocation12 + $0x40] sm:$0xff]  ;;  %v952_v36 = vld [vmem:[%s1902_s10 + $0x10] sm:$0xff]  ;;  %v1228_v18 = vld [vmem:[#allocation10 + $0x2] ss:$0 sm:$0xff] }
 0x35a   :  { %945 = vmatpush.msrb.mxu0 %v921_v40  ;;  %v1191_v8 = vld [vmem:[%s1902_s10 + $0x28] sm:$0xff] }
 0x35b   :  { %v534_v16 = vrot.slane %v533_v10, 1  ;;  %v527_v17 = vrot.slane %v526_v13, 1  ;;  %v1805_v9 = vld [vmem:[%s1916_s21 + $0x8] sm:$0xff] }
 0x35d   :  { %v528_v19 = vadd.f32 %v527_v17, %v526_v13  ;;  %v535_v20 = vadd.f32 %v534_v16, %v533_v10  ;;  %v1199_v16 = vld [vmem:[%s1902_s10 + $0x58] sm:$0xff]  ;;  %v1198_v17 = vld [vmem:[%s1902_s10 + $0x50] sm:$0xff] }
 0x35f   :  { %v557_v49 = vsel %vm305_vm6, %v528_v19, %v556_v21 }
 0x360   :  { %v558_v24 = vsel %vm307_vm7, %v535_v20, %v557_v49 }
 0x361   :  { %1172 = vmatmul.msk.f32.vlgmr.msra.gmra.mxu2 %vm197_vm0, %v558_v24  ;;  %1174 = vmatmul.msk.f32.vlgmr.msra.gmra.mxu3 %vm197_vm0, %v558_v24 }
 0x362   :  { %1176 = vmatmul.msk.f32.vlgmr.msra.gmra.mxu1 %vm197_vm0, %v558_v24  ;;  %707 = vmatpush.msra.mxu2 %v669_v23  ;;  %v1197_v23 = vld [vmem:[%s1902_s10 + $0x48] sm:$0xff] }
 0x363   :  { %912 = vmatpush.msra.mxu3 %v894_v53  ;;  %973 = vmatpush.msra.mxu1 %v953_v61 }
 0x364   :  { %708 = vmatpush.msra.mxu2 %v668_v25 }
 0x365   :  { %913 = vmatpush.msra.mxu3 %v893_v55  ;;  %974 = vmatpush.msra.mxu1 %v952_v36  ;;  %v1231_v55 = vld [vmem:[%s1903_s11 + $0x1] ss:$0 sm:$0xff] }
 0x366   :  { %709 = vmatpush.msra.mxu2 %v667_v26 }
 0x367   :  { %914 = vmatpush.msra.mxu3 %v892_v59  ;;  %975 = vmatpush.msra.mxu1 %v951_v2  ;;  %v1090_v2 = vld [vmem:[%s1905_s13] sm:$0xff] }
 0x368   :  { %710 = vmatpush.msra.mxu2 %v666_v29  ;;  %v1196_v29 = vld [vmem:[%s1902_s10 + $0x40] sm:$0xff] }
 0x369   :  { %1173 = vmatmul.msk.f32.vlgmr.msrb.gmra.mxu2 %vm197_vm0, %v1739_v7  ;;  %1178 = vmatmul.msk.f32.vlgmr.msrb.gmra.mxu3 %vm197_vm0, %v1630_v4 }
 0x36a   :  { %1180 = vmatmul.msk.f32.vlgmr.msrb.gmra.mxu1 %vm197_vm0, %v1630_v4  ;;  %882 = vmatpush.msrb.mxu2 %v862_v52  ;;  %v1230_v52 = vld [vmem:[%s1903_s11] ss:$0 sm:$0xff] }
 0x36b   :  { %915 = vmatpush.msra.mxu3 %v891_v63  ;;  %976 = vmatpush.msra.mxu1 %v950_v5  ;;  %v1093_v63 = vld [vmem:[%s1905_s13 + $0x18] sm:$0xff]  ;;  %v1126_v5 = vld [vmem:[#allocation13 + $0x28] sm:$0xff] }
 0x36c   :  { %883 = vmatpush.msrb.mxu2 %v861_v54  ;;  %1113 = vmatpush.msra.mxu0 %v1093_v63 }
 0x36d   :  { %1033 = vmatpush.msrb.mxu3 %v1199_v16 }
 0x36e   :  { %884 = vmatpush.msrb.mxu2 %v860_v58 }
 0x36f   :  { %1034 = vmatpush.msrb.mxu3 %v1198_v17  ;;  %v1123_v17 = vld [vmem:[#allocation13 + $0x10] sm:$0xff] }
 0x370   :  { %885 = vmatpush.msrb.mxu2 %v859_v62 }
 0x371   :  { %1177 = vmatmul.msk.f32.vlgmr.msra.gmra.mxu2 %vm197_vm0, %v1739_v7  ;;  %1035 = vmatpush.msrb.mxu3 %v1197_v23 }
 0x372   :  { %1003 = vmatpush.msra.mxu2 %v1193_v1  ;;  %1189 = vmatmul.msk.f32.vlgmr.msra.gmra.mxu1 %vm197_vm0, %v1805_v9 }
 0x373   :  { %1036 = vmatpush.msrb.mxu3 %v1196_v29 }
 0x374   :  { %1004 = vmatpush.msra.mxu2 %v1192_v12  ;;  %v1128_v12 = vld [vmem:[#allocation13 + $0x38] sm:$0xff] }
 0x375   :  { %1145 = vmatpush.msrb.mxu1 %v1128_v12 }
 0x376   :  { %1005 = vmatpush.msra.mxu2 %v1191_v8  ;;  %v1125_v8 = vld [vmem:[#allocation13 + $0x20] sm:$0xff] }
 0x378   :  { %1006 = vmatpush.msra.mxu2 %v1190_v14 }
 0x3bf   :  { %v656_v30 = vpop.f32.mrf.mxu0 }
 0x3c7   :  { %v776_v32 = vpop.f32.mrf.mxu0 }
 0x3c8   :  { %v777_v27 = vadd.f32 %v1224_v31, %v776_v32  ;;  %v1227_v31 = vld [vmem:[#allocation9 + $0x2] ss:$0 sm:$0xff] }
 0x3df   :  { %v692_v28 = vpop.f32.mrf.mxu1 }
 0x3e4   :  { %v578_v34 = vpop.f32.mrf.mxu2  ;;  %v636_v37 = vpop.f32.mrf.mxu3 }
 0x3e5   :  { %v657_v38 = vadd.f32 %v656_v30, %v636_v37 }
 0x3e7   :  { %v664_v39 = vadd.f32 %v1223_v33, %v657_v38  ;;  %v806_v21 = vpop.f32.mrf.mxu1 }
 0x3e8   :  { %v807_v32 = vadd.f32 %v1228_v18, %v806_v21  ;;  %v1234_v18 = vld [vmem:[%s1904_s12 + $0x2] ss:$0 sm:$0xff] }
 0x3e9   :  { %v829_v11 = vadd.f32 %v777_v27, %v664_v39 }
 0x3eb   :  { %v1182_v41 = vmul.f32 -1.442695, %v829_v11 }
 0x3ec   :  { %v601_v43 = vpop.f32.mrf.mxu2  ;;  %v746_v44 = vpop.f32.mrf.mxu3 }
 0x3ed   :  { %1255 = vpow2.f32 %v1182_v41  ;;  %v602_v45 = vadd.f32 %v601_v43, %v578_v34  ;;  %v747_v46 = vadd.f32 %v1226_v35, %v746_v44 }
 0x3ef   :  { %v608_v48 = vadd.f32 %v1225_v42, %v602_v45 }
 0x3f1   :  { %v809_v7 = vadd.f32 %v747_v46, %v608_v48 }
 0x3f3   :  { %v1256_v47 = vpop.eup %1255  ;;  %v1181_v50 = vmul.f32 -1.442695, %v809_v7 }
 0x3f4   :  { %v1771_v51 = vadd.f32 1.0, %v1256_v47  ;;  %v712_v20 = vpop.f32.mrf.mxu2 }
 0x3f5   :  { %1257 = vpow2.f32 %v1181_v50  ;;  %v713_v30 = vadd.f32 %v712_v20, %v692_v28  ;;  %v1091_v28 = vld [vmem:[%s1905_s13 + $0x8] sm:$0xff] }
 0x3f6   :  { %1259 = vrcp.f32 %v1771_v51  ;;  %v845_v39 = vand.u32 2147483648, %v1771_v51  ;;  %vm839_vm14 = vweird.f32 %v1771_v51  ;;  %v843_v41 = vand.u32 2147483647, %v1771_v51 }
 0x3f7   :  { %v720_v11 = vadd.f32 %v1227_v31, %v713_v30 }
 0x3f8   :  { %v846_v44 = vor.u32 1.1754944e-38, %v845_v39  ;;  %vm844_vm1 = vcmp.eq.f32.partialorder %v843_v41, 8.507059e+37 }
 0x3fb   :  { %v1258_v6 = vpop.eup %1257 }
 0x3fc   :  { %v1774_v57 = vadd.f32 1.0, %v1258_v6  ;;  %v1780_v0 = vpop.eup %1259 }
 0x3fd   :  { %v835_v3 = vmul.f32 %v1780_v0, %v1771_v51  ;;  %vm840_vm13 = vweird.f32 %v1780_v0  ;;  %v978_v51 = vpop.f32.mrf.mxu1 }
 0x3fe   :  { %1261 = vrcp.f32 %v1774_v57  ;;  %v825_v49 = vand.u32 2147483648, %v1774_v57  ;;  %v823_v25 = vand.u32 2147483647, %v1774_v57  ;;  %vm819_vm10 = vweird.f32 %v1774_v57  ;;  %vm841_vm15 = vmor %vm839_vm14, %vm840_vm13 }
 0x3ff   :  { %v836_v15 = vsub.f32 1.0, %v835_v3  ;;  %v1127_v3 = vld [vmem:[#allocation13 + $0x30] sm:$0xff] }
 0x400   :  { %v826_v34 = vor.u32 1.1754944e-38, %v825_v49  ;;  %vm824_vm12 = vcmp.eq.f32.partialorder %v823_v25, 8.507059e+37  ;;  %1146 = vmatpush.msrb.mxu1 %v1127_v3 }
 0x401   :  { %v837_v26 = vmul.f32 %v1780_v0, %v836_v15  ;;  %v1124_v15 = vld [vmem:[#allocation13 + $0x18] sm:$0xff] }
 0x402   :  { %1147 = vmatpush.msrb.mxu1 %v1126_v5 }
 0x403   :  { %v838_v27 = vadd.f32 %v1780_v0, %v837_v26 }
 0x404   :  { %v1262_v10 = vpop.eup %1261  ;;  %1148 = vmatpush.msrb.mxu1 %v1125_v8 }
 0x405   :  { %v815_v13 = vmul.f32 %v1262_v10, %v1774_v57  ;;  %vm820_vm9 = vweird.f32 %v1262_v10  ;;  %v842_v43 = vsel %vm841_vm15, %v1780_v0, %v838_v27  ;;  %v1233_v57 = vld [vmem:[%s1904_s12 + $0x1] ss:$0 sm:$0xff]  ;;  %v1092_v0 = vld [vmem:[%s1905_s13 + $0x10] sm:$0xff] }
 0x406   :  { %vm821_vm11 = vmor %vm819_vm10, %vm820_vm9  ;;  %v847_v45 = vsel %vm844_vm1, %v846_v44, %v842_v43  ;;  %1114 = vmatpush.msra.mxu0 %v1092_v0  ;;  %1149 = vmatpush.msrb.mxu1 %v1124_v15  ;;  %vm1133_vm10 = vcmask 523264  }
 0x407   :  { %v816_v19 = vsub.f32 1.0, %v815_v13  ;;  %v852_v46 = vsub.f32 1.0, %v847_v45  ;;  %v854_v47 = vmul.f32 %v847_v45, %v1630_v4  ;;  %v1232_v4 = vld [vmem:[%s1904_s12] ss:$0 sm:$0xff] }
 0x408   :  { %v979_v53 = vadd.f32 %v1232_v4, %v978_v51  ;;  %1115 = vmatpush.msra.mxu0 %v1091_v28  ;;  %1150 = vmatpush.msrb.mxu1 %v1123_v17  ;;  %v1122_v4 = vld [vmem:[#allocation13 + $0x8] sm:$0xff]  ;;  %v1121_v51 = vld [vmem:[#allocation13] sm:$0xff] }
 0x409   :  { %v817_v24 = vmul.f32 %v1262_v10, %v816_v19 }
 0x40a   :  { %1116 = vmatpush.msra.mxu0 %v1090_v2  ;;  %1151 = vmatpush.msrb.mxu1 %v1122_v4 }
 0x40b   :  { %v818_v33 = vadd.f32 %v1262_v10, %v817_v24  ;;  %v1229_v24 = vld [vmem:[%s1903_s11 + $0x2] ss:$0 sm:$0xff] }
 0x40c   :  { %1152 = vmatpush.msrb.mxu1 %v1121_v51 }
 0x40d   :  { %v822_v37 = vsel %vm821_vm11, %v1262_v10, %v818_v33 }
 0x40e   :  { %v827_v38 = vsel %vm824_vm12, %v826_v34, %v822_v37 }
 0x40f   :  { %v849_v35 = vmul.f32 %v827_v38, %v807_v32 }
 0x411   :  { %v850_v42 = vadd.f32 %v849_v35, %v720_v11 }
 0x413   :  { %1263 = vtanh.f32 %v850_v42 }
 0x419   :  { %v1264_v48 = vpop.eup %1263 }
 0x41a   :  { %v853_v7 = vmul.f32 %v1264_v48, %v852_v46 }
 0x41c   :  { %v855_v50 = vadd.f32 %v854_v47, %v853_v7 }
 0x41e   :  { %856 = vst.msk [vmem:[%s1910_s18] sm:$0xff] %vm197_vm0, %v855_v50  ;;  %1184 = vmatmul.msk.f32.vlgmr.msrb.gmra.mxu2 %vm197_vm0, %v855_v50  ;;  %1186 = vmatmul.msk.f32.vlgmr.msra.gmra.mxu3 %vm197_vm0, %v855_v50 }
 0x41f   :  { %1188 = vmatmul.msk.f32.vlgmr.msrb.gmra.mxu0 %vm197_vm0, %v855_v50 }
 0x426   :  { %1195 = vmatmul.msk.f32.vlgmr.msra.gmra.mxu2 %vm197_vm0, %v1805_v9  ;;  %1201 = vmatmul.msk.f32.vlgmr.msrb.gmra.mxu3 %vm197_vm0, %v1805_v9 }
 0x49c   :  { %v947_v30 = vpop.f32.mrf.mxu0 }
 0x49d   :  { %v948_v37 = vadd.f32 %v1229_v24, %v947_v30 }
 0x4a1   :  { %v887_v22 = vpop.f32.mrf.mxu2  ;;  %v917_v58 = vpop.f32.mrf.mxu3 }
 0x4a2   :  { %v888_v6 = vadd.f32 %v1230_v52, %v887_v22  ;;  %v918_v60 = vadd.f32 %v1231_v55, %v917_v58  ;;  %v1235_v52 = vld [vmem:[%s1906_s14] ss:$0 sm:$0xff] }
 0x4a4   :  { %v1041_v54 = vadd.f32 %v979_v53, %v888_v6 }
 0x4a6   :  { %v1202_v56 = vmul.f32 -1.442695, %v1041_v54 }
 0x4a8   :  { %1265 = vpow2.f32 %v1202_v56 }
 0x4a9   :  { %v1008_v59 = vpop.f32.mrf.mxu2  ;;  %v1038_v20 = vpop.f32.mrf.mxu3 }
 0x4aa   :  { %v1009_v61 = vadd.f32 %v1233_v57, %v1008_v59  ;;  %v1039_v25 = vadd.f32 %v1234_v18, %v1038_v20 }
 0x4ac   :  { %v1061_v62 = vadd.f32 %v1009_v61, %v918_v60 }
 0x4ae   :  { %v1266_v40 = vpop.eup %1265  ;;  %v1203_v36 = vmul.f32 -1.442695, %v1061_v62 }
 0x4af   :  { %v1045_v1 = vadd.f32 1.0, %v1266_v40 }
 0x4b0   :  { %1267 = vpow2.f32 %v1203_v36 }
 0x4b1   :  { %1269 = vrcp.f32 %v1045_v1  ;;  %v1057_v21 = vand.u32 2147483648, %v1045_v1  ;;  %v1055_v23 = vand.u32 2147483647, %v1045_v1  ;;  %vm1051_vm3 = vweird.f32 %v1045_v1 }
 0x4b3   :  { %v1058_v31 = vor.u32 1.1754944e-38, %v1057_v21  ;;  %vm1056_vm5 = vcmp.eq.f32.partialorder %v1055_v23, 8.507059e+37 }
 0x4b6   :  { %v1268_v10 = vpop.eup %1267 }
 0x4b7   :  { %v1270_v13 = vpop.eup %1269  ;;  %v1065_v14 = vadd.f32 1.0, %v1268_v10 }
 0x4b8   :  { %v1047_v16 = vmul.f32 %v1270_v13, %v1045_v1  ;;  %vm1052_vm2 = vweird.f32 %v1270_v13 }
 0x4b9   :  { %1271 = vrcp.f32 %v1065_v14  ;;  %vm1053_vm4 = vmor %vm1051_vm3, %vm1052_vm2  ;;  %v1077_v39 = vand.u32 2147483648, %v1065_v14  ;;  %v1075_v35 = vand.u32 2147483647, %v1065_v14  ;;  %vm1071_vm7 = vweird.f32 %v1065_v14 }
 0x4ba   :  { %v1048_v19 = vsub.f32 1.0, %v1047_v16 }
 0x4bb   :  { %v1078_v43 = vor.u32 1.1754944e-38, %v1077_v39  ;;  %vm1076_vm9 = vcmp.eq.f32.partialorder %v1075_v35, 8.507059e+37 }
 0x4bc   :  { %v1049_v49 = vmul.f32 %v1270_v13, %v1048_v19 }
 0x4be   :  { %v1050_v26 = vadd.f32 %v1270_v13, %v1049_v49 }
 0x4bf   :  { %v1272_v29 = vpop.eup %1271 }
 0x4c0   :  { %v1067_v32 = vmul.f32 %v1272_v29, %v1065_v14  ;;  %v1054_v33 = vsel %vm1053_vm4, %v1270_v13, %v1050_v26  ;;  %vm1072_vm6 = vweird.f32 %v1272_v29 }
 0x4c1   :  { %v1059_v34 = vsel %vm1056_vm5, %v1058_v31, %v1054_v33  ;;  %vm1073_vm8 = vmor %vm1071_vm7, %vm1072_vm6 }
 0x4c2   :  { %v1068_v38 = vsub.f32 1.0, %v1067_v32  ;;  %v1081_v27 = vmul.f32 %v1059_v34, %v1039_v25 }
 0x4c4   :  { %v1069_v11 = vmul.f32 %v1272_v29, %v1068_v38  ;;  %v1082_v41 = vadd.f32 %v1081_v27, %v948_v37 }
 0x4c6   :  { %v1070_v42 = vadd.f32 %v1272_v29, %v1069_v11  ;;  %1273 = vtanh.f32 %v1082_v41 }
 0x4c8   :  { %v1074_v44 = vsel %vm1073_vm8, %v1272_v29, %v1070_v42 }
 0x4c9   :  { %v1079_v45 = vsel %vm1076_vm9, %v1078_v43, %v1074_v44 }
 0x4ca   :  { %v1084_v46 = vsub.f32 1.0, %v1079_v45  ;;  %v1086_v47 = vmul.f32 %v1805_v9, %v1079_v45  ;;  %v1236_v9 = vld [vmem:[%s1908_s16] ss:$0 sm:$0xff] }
 0x4cc   :  { %v1274_v48 = vpop.eup %1273 }
 0x4cd   :  { %v1085_v7 = vmul.f32 %v1274_v48, %v1084_v46 }
 0x4cf   :  { %v1087_v50 = vadd.f32 %v1086_v47, %v1085_v7 }
 0x4d1   :  { %1204 = vst.msk [vmem:[%s1910_s18 + $0x8] sm:$0xff] %vm197_vm0, %v1087_v50  ;;  %1205 = vmatmul.msk.f32.vlgmr.msra.gmra.mxu0 %vm197_vm0, %v1087_v50 }
 0x54e   :  { %v1118_v53 = vpop.f32.mrf.mxu0 }
 0x54f   :  { %v1119_v22 = vadd.f32 %v1235_v52, %v1118_v53 }
 0x551   :  { %1206 = vmatmul.msk.f32.vlgmr.msrb.gmra.mxu1 %vm1133_vm10, %v1119_v22 }
 0x5ce   :  { %v1154_v6 = vpop.f32.mrf.mxu1 }
 0x5cf   :  { %v1155_v54 = vadd.f32 %v1236_v9, %v1154_v6 }
 0x5d1   :  { %1157 = vst [vmem:[%s1909_s17] sm:$0xff] %v1155_v54 }
 0x5d2   :  { %1166 = vsyncpa [#allocation3], 1 }
 0x5d3   :  { %1167 = vsyncpa [#allocation5], 1 }
 0x5d4   :  { %1168 = vsyncpa [#allocation8], 1 }
 0x5d5   :  { %1169 = vsyncpa [#allocation11], 1 }
 0x5d6   :  { %1170 = vsyncpa [#allocation14], 1 }

</bundles_post_ra>
